<compile_context>
chip_gen: v7x
topology: tpu7x:2x2x1
jax: 0.10.0
libtpu: 0.0.40
codegen_flags: <defaults>
</compile_context>

<pallas_src>
import jax
import jax.numpy as jnp
from jax.experimental import pallas as pl
from jax.experimental.pallas import tpu as pltpu

# ----------------------------- config (small synthetic BERT) -----------------------------
VOCAB = 30
TYPE_VOCAB = 2
MAX_POS = 16
HIDDEN = 32          # == `hidden_size` / `embed_size` of the PyTorch module
HEADS = 4
HEAD_DIM = HIDDEN // HEADS
LAYERS = 2
INTER = 64
NUM_CLASSES = 2
ATTN_SCALE = 1.0 / (HEAD_DIM ** 0.5)


# ----------------------------- Pallas fused encoder kernel -----------------------------
def _full_spec(shape):
    """Whole-array block (grid=(1,)); full dims satisfy the (8,128) full-dim exception."""
    n = len(shape)
    return pl.BlockSpec(shape, lambda i, _n=n: (0,) * _n)


def _layernorm(x, g, b):
    mean = jnp.mean(x, axis=-1, keepdims=True)
    var = jnp.mean(jnp.square(x - mean), axis=-1, keepdims=True)
    return (x - mean) * jax.lax.rsqrt(var + 1e-12) * g + b


def _make_encoder_kernel(B, S):
    M = B * S

    def kernel(x_ref, bias_ref, emb_g_ref, emb_b_ref,
               wqkv_ref, bqkv_ref, wo_ref, bo_ref,
               ln1_g_ref, ln1_b_ref,
               wi_ref, bi_ref, wo2_ref, bo2_ref,
               ln2_g_ref, ln2_b_ref,
               pool_w_ref, pool_b_ref,
               pooled_ref):
        # Embedding LayerNorm (fused into the encoder kernel).
        x = _layernorm(x_ref[...], emb_g_ref[...], emb_b_ref[...])          # (M, H)
        # Additive attention-mask bias, broadcast ONCE (same for every layer / head).
        bias3 = bias_ref[...][:, None, :]                                    # (B, 1, S)

        for l in range(LAYERS):                                              # unrolled, weights stay in VMEM
            # Fused QKV projection: one (M,H) x (H,3H) MXU pass instead of three.
            qkv = (jnp.dot(x, wqkv_ref[l], preferred_element_type=jnp.float32)
                   + bqkv_ref[l])                                            # (M, 3H)
            # Fold the 1/sqrt(d) scale into Q once (cheaper than scaling every (B,S,S) score tile).
            q = (qkv[:, 0 * HIDDEN:1 * HIDDEN] * ATTN_SCALE).reshape(B, S, HIDDEN)
            k = qkv[:, 1 * HIDDEN:2 * HIDDEN].reshape(B, S, HIDDEN)
            v = qkv[:, 2 * HIDDEN:3 * HIDDEN].reshape(B, S, HIDDEN)

            # All B batches handled by batched einsums; heads unrolled in-kernel (no launches).
            ctx_heads = []
            for h in range(HEADS):
                lo, hi = h * HEAD_DIM, (h + 1) * HEAD_DIM
                qh, kh, vh = q[:, :, lo:hi], k[:, :, lo:hi], v[:, :, lo:hi]  # (B, S, D)
                scores = jnp.einsum('bqd,bkd->bqk', qh, kh,
                                    preferred_element_type=jnp.float32)
                scores = scores + bias3                                      # (B, S, S)
                m = jnp.max(scores, axis=-1, keepdims=True)
                p = jnp.exp(scores - m)
                p = p * pl.reciprocal(jnp.sum(p, axis=-1, keepdims=True), approx=True)
                ctx_heads.append(jnp.einsum('bqk,bkd->bqd', p, vh,
                                            preferred_element_type=jnp.float32))
            ctx = jnp.concatenate(ctx_heads, axis=-1).reshape(M, HIDDEN)

            attn_out = (jnp.dot(ctx, wo_ref[l], preferred_element_type=jnp.float32)
                        + bo_ref[l])
            x = _layernorm(x + attn_out, ln1_g_ref[l], ln1_b_ref[l])         # fused residual + LN

            ffn = jnp.dot(x, wi_ref[l], preferred_element_type=jnp.float32) + bi_ref[l]
            # TODO(synk): exact erf-GELU replaced by the tanh-approximate GELU inside the kernel
            #             (erf has no guaranteed Mosaic lowering; tanh form is original-BERT gelu).
            ffn = jax.nn.gelu(ffn, approximate=True)
            ffn = jnp.dot(ffn, wo2_ref[l], preferred_element_type=jnp.float32) + bo2_ref[l]
            x = _layernorm(x + ffn, ln2_g_ref[l], ln2_b_ref[l])              # fused residual + LN

        # Pooler: tanh(W * h_[CLS] + b)  (== BertModel's cls_out), folded into the kernel tail.
        cls_tok = x.reshape(B, S, HIDDEN)[:, 0, :]                           # (B, H)
        pooled_ref[...] = jnp.tanh(
            jnp.dot(cls_tok, pool_w_ref[...], preferred_element_type=jnp.float32)
            + pool_b_ref[...])

    return kernel


def bert_encoder_pooled(params, x_emb, mask_bias, B, S):
    """Runs the whole BERT encoder + pooler in a single pallas_call. Returns pooled (B, HIDDEN)."""
    args = (x_emb, mask_bias,
            params["emb_ln_g"], params["emb_ln_b"],
            params["wqkv"], params["bqkv"], params["wo"], params["bo"],
            params["ln1_g"], params["ln1_b"],
            params["wi"], params["bi"], params["wo2"], params["bo2"],
            params["ln2_g"], params["ln2_b"],
            params["pool_w"], params["pool_b"])
    return pl.pallas_call(
        _make_encoder_kernel(B, S),
        out_shape=jax.ShapeDtypeStruct((B, HIDDEN), jnp.float32),
        grid=(1,),  # whole problem (~140 KB) fits VMEM on v5e/v6e/v7x; keep as a single block
        in_specs=[_full_spec(a.shape) for a in args],
        out_specs=_full_spec((B, HIDDEN)),
        compiler_params=pltpu.CompilerParams(dimension_semantics=("arbitrary",)),
    )(*args)


# ----------------------------- parameter init (stacked per-layer weights) -----------------------------
def init_params(key):
    def nrm(k, shape):
        return 0.02 * jax.random.normal(k, shape, dtype=jnp.float32)

    keys = iter(jax.random.split(key, 16))
    return {
        "word_emb": nrm(next(keys), (VOCAB, HIDDEN)),
        "pos_emb": nrm(next(keys), (MAX_POS, HIDDEN)),
        "type_emb": nrm(next(keys), (TYPE_VOCAB, HIDDEN)),
        "emb_ln_g": jnp.ones((1, HIDDEN), jnp.float32),
        "emb_ln_b": jnp.zeros((1, HIDDEN), jnp.float32),
        # per-layer weights stacked on a leading layer axis; Q/K/V concatenated along output dim
        "wqkv": nrm(next(keys), (LAYERS, HIDDEN, 3 * HIDDEN)),
        "bqkv": jnp.zeros((LAYERS, 1, 3 * HIDDEN), jnp.float32),
        "wo": nrm(next(keys), (LAYERS, HIDDEN, HIDDEN)),
        "bo": jnp.zeros((LAYERS, 1, HIDDEN), jnp.float32),
        "ln1_g": jnp.ones((LAYERS, 1, HIDDEN), jnp.float32),
        "ln1_b": jnp.zeros((LAYERS, 1, HIDDEN), jnp.float32),
        "wi": nrm(next(keys), (LAYERS, HIDDEN, INTER)),
        "bi": jnp.zeros((LAYERS, 1, INTER), jnp.float32),
        "wo2": nrm(next(keys), (LAYERS, INTER, HIDDEN)),
        "bo2": jnp.zeros((LAYERS, 1, HIDDEN), jnp.float32),
        "ln2_g": jnp.ones((LAYERS, 1, HIDDEN), jnp.float32),
        "ln2_b": jnp.zeros((LAYERS, 1, HIDDEN), jnp.float32),
        "pool_w": nrm(next(keys), (HIDDEN, HIDDEN)),
        "pool_b": jnp.zeros((1, HIDDEN), jnp.float32),
        "cls_w": nrm(next(keys), (HIDDEN, NUM_CLASSES)),
        "cls_b": jnp.zeros((NUM_CLASSES,), jnp.float32),
    }


# ----------------------------- forward (mirrors Model.forward) -----------------------------
def model_forward(params, ids, label, segment):
    B, S = ids.shape

    # mask = torch.ne(context, 0)  ->  additive attention bias (B, S)
    mask = (ids != 0).astype(jnp.float32)
    mask_bias = (1.0 - mask) * -10000.0

    # BERT embeddings (gather + sum stay in plain JAX; LayerNorm is fused into the kernel)
    pos = jnp.arange(S)
    x = (jnp.take(params["word_emb"], ids, axis=0)
         + params["pos_emb"][pos][None, :, :]
         + jnp.take(params["type_emb"], segment, axis=0))       # (B, S, H)
    x = x.reshape(B * S, HIDDEN)

    # Entire 2-layer encoder + tanh pooler in ONE Pallas kernel.
    pooled = bert_encoder_pooled(params, x, mask_bias, B, S)    # (B, H)

    # TODO(synk): nn.Dropout(0.1) — identity in eval mode; training-mode RNG not reproduced.
    # Classifier (32x2) + loss: ~100 FLOPs, kept in plain JAX (a pallas_call would be pure overhead).
    logits = pooled @ params["cls_w"] + params["cls_b"]         # (B, 2)

    # loss = CrossEntropyLoss()(LogSoftmax(logits), label) — CE re-applies log_softmax,
    # so the double log_softmax of the original module is reproduced exactly.
    log_p = jax.nn.log_softmax(logits, axis=-1)
    log_p2 = jax.nn.log_softmax(log_p, axis=-1)
    lbl = label.reshape(-1)
    nll = -jnp.take_along_axis(log_p2, lbl[:, None], axis=-1)[:, 0]
    loss = jnp.mean(nll)
    return loss, logits


# ----------------------------- main -----------------------------
if __name__ == "__main__":
    key = jax.random.PRNGKey(0)
    pk, ik, sk, lk = jax.random.split(key, 4)
    params = init_params(pk)

    B, S = 2, 8
    ids = jax.random.randint(ik, (B, S), 1, VOCAB, dtype=jnp.int32)
    ids = ids.at[:, -2:].set(0)                 # trailing padding -> exercises torch.ne(ids, 0) mask
    segment = jax.random.randint(sk, (B, S), 0, TYPE_VOCAB, dtype=jnp.int32)
    label = jax.random.randint(lk, (B,), 0, NUM_CLASSES, dtype=jnp.int32)

    loss, logits = jax.jit(model_forward)(params, ids, label, segment)
    jax.block_until_ready((loss, logits))
    print("KERNEL_OK")
</pallas_src>

<mosaic_0001>
module attributes {stable_mosaic.version = 11 : i64} {
  func.func @kernel(%arg0: i32, %arg1: memref<16x32xf32, #tpu.memory_space<vmem>>, %arg2: memref<2x8xf32, #tpu.memory_space<vmem>>, %arg3: memref<1x32xf32, #tpu.memory_space<vmem>>, %arg4: memref<1x32xf32, #tpu.memory_space<vmem>>, %arg5: memref<2x32x96xf32, #tpu.memory_space<vmem>>, %arg6: memref<2x1x96xf32, #tpu.memory_space<vmem>>, %arg7: memref<2x32x32xf32, #tpu.memory_space<vmem>>, %arg8: memref<2x1x32xf32, #tpu.memory_space<vmem>>, %arg9: memref<2x1x32xf32, #tpu.memory_space<vmem>>, %arg10: memref<2x1x32xf32, #tpu.memory_space<vmem>>, %arg11: memref<2x32x64xf32, #tpu.memory_space<vmem>>, %arg12: memref<2x1x64xf32, #tpu.memory_space<vmem>>, %arg13: memref<2x64x32xf32, #tpu.memory_space<vmem>>, %arg14: memref<2x1x32xf32, #tpu.memory_space<vmem>>, %arg15: memref<2x1x32xf32, #tpu.memory_space<vmem>>, %arg16: memref<2x1x32xf32, #tpu.memory_space<vmem>>, %arg17: memref<32x32xf32, #tpu.memory_space<vmem>>, %arg18: memref<1x32xf32, #tpu.memory_space<vmem>>, %arg19: memref<2x32xf32, #tpu.memory_space<vmem>>) attributes {dimension_semantics = [#tpu.dimension_semantics<arbitrary>], iteration_bounds = array<i64: 1>, scalar_prefetch = 0 : i64, scratch_operands = 0 : i64, tpu.core_type = #tpu.core_type<tc>, window_params = [{pipeline_mode = #tpu.pipeline_mode<synchronous>, transform_indices = @transform_0, window_bounds = array<i64: 16, 32>}, {pipeline_mode = #tpu.pipeline_mode<synchronous>, transform_indices = @transform_1, window_bounds = array<i64: 2, 8>}, {pipeline_mode = #tpu.pipeline_mode<synchronous>, transform_indices = @transform_2, window_bounds = array<i64: 1, 32>}, {pipeline_mode = #tpu.pipeline_mode<synchronous>, transform_indices = @transform_3, window_bounds = array<i64: 1, 32>}, {pipeline_mode = #tpu.pipeline_mode<synchronous>, transform_indices = @transform_4, window_bounds = array<i64: 2, 32, 96>}, {pipeline_mode = #tpu.pipeline_mode<synchronous>, transform_indices = @transform_5, window_bounds = array<i64: 2, 1, 96>}, {pipeline_mode = #tpu.pipeline_mode<synchronous>, transform_indices = @transform_6, window_bounds = array<i64: 2, 32, 32>}, {pipeline_mode = #tpu.pipeline_mode<synchronous>, transform_indices = @transform_7, window_bounds = array<i64: 2, 1, 32>}, {pipeline_mode = #tpu.pipeline_mode<synchronous>, transform_indices = @transform_8, window_bounds = array<i64: 2, 1, 32>}, {pipeline_mode = #tpu.pipeline_mode<synchronous>, transform_indices = @transform_9, window_bounds = array<i64: 2, 1, 32>}, {pipeline_mode = #tpu.pipeline_mode<synchronous>, transform_indices = @transform_10, window_bounds = array<i64: 2, 32, 64>}, {pipeline_mode = #tpu.pipeline_mode<synchronous>, transform_indices = @transform_11, window_bounds = array<i64: 2, 1, 64>}, {pipeline_mode = #tpu.pipeline_mode<synchronous>, transform_indices = @transform_12, window_bounds = array<i64: 2, 64, 32>}, {pipeline_mode = #tpu.pipeline_mode<synchronous>, transform_indices = @transform_13, window_bounds = array<i64: 2, 1, 32>}, {pipeline_mode = #tpu.pipeline_mode<synchronous>, transform_indices = @transform_14, window_bounds = array<i64: 2, 1, 32>}, {pipeline_mode = #tpu.pipeline_mode<synchronous>, transform_indices = @transform_15, window_bounds = array<i64: 2, 1, 32>}, {pipeline_mode = #tpu.pipeline_mode<synchronous>, transform_indices = @transform_16, window_bounds = array<i64: 32, 32>}, {pipeline_mode = #tpu.pipeline_mode<synchronous>, transform_indices = @transform_17, window_bounds = array<i64: 1, 32>}, {pipeline_mode = #tpu.pipeline_mode<synchronous>, transform_indices = @transform_18, window_bounds = array<i64: 2, 32>}]} {
    %c0 = arith.constant 0 : index
    %c0_0 = arith.constant 0 : index
    %0 = vector.load %arg1[%c0, %c0_0] : memref<16x32xf32, #tpu.memory_space<vmem>>, vector<16x32xf32>
    %c0_1 = arith.constant 0 : index
    %c0_2 = arith.constant 0 : index
    %1 = vector.load %arg3[%c0_1, %c0_2] : memref<1x32xf32, #tpu.memory_space<vmem>>, vector<1x32xf32>
    %c0_3 = arith.constant 0 : index
    %c0_4 = arith.constant 0 : index
    %2 = vector.load %arg4[%c0_3, %c0_4] : memref<1x32xf32, #tpu.memory_space<vmem>>, vector<1x32xf32>
    %cst = arith.constant dense<0.000000e+00> : vector<16xf32>
    %3 = vector.multi_reduction <add>, %0, %cst [1] : vector<16x32xf32> to vector<16xf32>
    %4 = vector.shape_cast %3 : vector<16xf32> to vector<16x1xf32>
    %cst_5 = arith.constant 3.200000e+01 : f32
    %5 = vector.broadcast %cst_5 : f32 to vector<16x1xf32>
    %6 = arith.divf %4, %5 : vector<16x1xf32>
    %7 = vector.broadcast %6 : vector<16x1xf32> to vector<16x32xf32>
    %8 = arith.subf %0, %7 : vector<16x32xf32>
    %9 = arith.mulf %8, %8 : vector<16x32xf32>
    %cst_6 = arith.constant dense<0.000000e+00> : vector<16xf32>
    %10 = vector.multi_reduction <add>, %9, %cst_6 [1] : vector<16x32xf32> to vector<16xf32>
    %11 = vector.shape_cast %10 : vector<16xf32> to vector<16x1xf32>
    %cst_7 = arith.constant 3.200000e+01 : f32
    %12 = vector.broadcast %cst_7 : f32 to vector<16x1xf32>
    %13 = arith.divf %11, %12 : vector<16x1xf32>
    %14 = vector.broadcast %6 : vector<16x1xf32> to vector<16x32xf32>
    %15 = arith.subf %0, %14 : vector<16x32xf32>
    %cst_8 = arith.constant 9.99999996E-13 : f32
    %16 = vector.broadcast %cst_8 : f32 to vector<16x1xf32>
    %17 = arith.addf %13, %16 : vector<16x1xf32>
    %18 = math.rsqrt %17 : vector<16x1xf32>
    %19 = vector.broadcast %18 : vector<16x1xf32> to vector<16x32xf32>
    %20 = arith.mulf %15, %19 : vector<16x32xf32>
    %21 = vector.broadcast %1 : vector<1x32xf32> to vector<16x32xf32>
    %22 = arith.mulf %20, %21 : vector<16x32xf32>
    %23 = vector.broadcast %2 : vector<1x32xf32> to vector<16x32xf32>
    %24 = arith.addf %22, %23 : vector<16x32xf32>
    %c0_9 = arith.constant 0 : index
    %c0_10 = arith.constant 0 : index
    %25 = vector.load %arg2[%c0_9, %c0_10] : memref<2x8xf32, #tpu.memory_space<vmem>>, vector<2x8xf32>
    %26 = vector.shape_cast %25 : vector<2x8xf32> to vector<2x1x8xf32>
    %c0_11 = arith.constant 0 : index
    %c0_12 = arith.constant 0 : index
    %c0_13 = arith.constant 0 : index
    %27 = vector.load %arg5[%c0_11, %c0_12, %c0_13] : memref<2x32x96xf32, #tpu.memory_space<vmem>>, vector<1x32x96xf32>
    %28 = vector.shape_cast %27 : vector<1x32x96xf32> to vector<32x96xf32>
    %cst_14 = arith.constant dense<0.000000e+00> : vector<16x96xf32>
    %29 = tpu.matmul %24, %28, %cst_14 {dimension_numbers = #tpu.dot_dimension_numbers<[1], [0], [0], [1], [0, 0, 1, 1], [], []>} : vector<16x32xf32>, vector<32x96xf32>, vector<16x96xf32> -> vector<16x96xf32>
    %c0_15 = arith.constant 0 : index
    %c0_16 = arith.constant 0 : index
    %c0_17 = arith.constant 0 : index
    %30 = vector.load %arg6[%c0_15, %c0_16, %c0_17] : memref<2x1x96xf32, #tpu.memory_space<vmem>>, vector<1x1x96xf32>
    %31 = vector.shape_cast %30 : vector<1x1x96xf32> to vector<1x96xf32>
    %32 = vector.broadcast %31 : vector<1x96xf32> to vector<16x96xf32>
    %33 = arith.addf %29, %32 : vector<16x96xf32>
    %34 = vector.extract_strided_slice %33 {offsets = [0, 0], sizes = [16, 32], strides = [1, 1]} : vector<16x96xf32> to vector<16x32xf32>
    %cst_18 = arith.constant 0.353553385 : f32
    %35 = vector.broadcast %cst_18 : f32 to vector<16x32xf32>
    %36 = arith.mulf %34, %35 : vector<16x32xf32>
    %37 = vector.shape_cast %36 : vector<16x32xf32> to vector<2x8x32xf32>
    %38 = vector.extract_strided_slice %33 {offsets = [0, 32], sizes = [16, 32], strides = [1, 1]} : vector<16x96xf32> to vector<16x32xf32>
    %39 = vector.shape_cast %38 : vector<16x32xf32> to vector<2x8x32xf32>
    %40 = vector.extract_strided_slice %33 {offsets = [0, 64], sizes = [16, 32], strides = [1, 1]} : vector<16x96xf32> to vector<16x32xf32>
    %41 = vector.shape_cast %40 : vector<16x32xf32> to vector<2x8x32xf32>
    %42 = vector.extract_strided_slice %37 {offsets = [0, 0, 0], sizes = [2, 8, 8], strides = [1, 1, 1]} : vector<2x8x32xf32> to vector<2x8x8xf32>
    %43 = vector.extract_strided_slice %39 {offsets = [0, 0, 0], sizes = [2, 8, 8], strides = [1, 1, 1]} : vector<2x8x32xf32> to vector<2x8x8xf32>
    %44 = vector.extract_strided_slice %41 {offsets = [0, 0, 0], sizes = [2, 8, 8], strides = [1, 1, 1]} : vector<2x8x32xf32> to vector<2x8x8xf32>
    "tpu.trace_start"() <{level = 10 : i32, message = "bqd,bkd->bqk"}> : () -> ()
    %cst_19 = arith.constant dense<0.000000e+00> : vector<2x8x8xf32>
    %45 = tpu.matmul %42, %43, %cst_19 {dimension_numbers = #tpu.dot_dimension_numbers<[2], [2], [1], [1], [0, 0, 0, 1, 1, 1], [0], [0]>} : vector<2x8x8xf32>, vector<2x8x8xf32>, vector<2x8x8xf32> -> vector<2x8x8xf32>
    "tpu.trace_stop"() : () -> ()
    %46 = vector.broadcast %26 : vector<2x1x8xf32> to vector<2x8x8xf32>
    %47 = arith.addf %45, %46 : vector<2x8x8xf32>
    %cst_20 = arith.constant dense<0xFF800000> : vector<2x8xf32>
    %48 = vector.multi_reduction <maximumf>, %47, %cst_20 [2] : vector<2x8x8xf32> to vector<2x8xf32>
    %49 = vector.shape_cast %48 : vector<2x8xf32> to vector<2x8x1xf32>
    %50 = vector.broadcast %49 : vector<2x8x1xf32> to vector<2x8x8xf32>
    %51 = arith.subf %47, %50 : vector<2x8x8xf32>
    %52 = math.exp %51 : vector<2x8x8xf32>
    %cst_21 = arith.constant dense<0.000000e+00> : vector<2x8xf32>
    %53 = vector.multi_reduction <add>, %52, %cst_21 [2] : vector<2x8x8xf32> to vector<2x8xf32>
    %54 = vector.shape_cast %53 : vector<2x8xf32> to vector<2x8x1xf32>
    %55 = tpu.reciprocal %54 {approx = true} : vector<2x8x1xf32> -> vector<2x8x1xf32>
    %56 = vector.broadcast %55 : vector<2x8x1xf32> to vector<2x8x8xf32>
    %57 = arith.mulf %52, %56 : vector<2x8x8xf32>
    "tpu.trace_start"() <{level = 10 : i32, message = "bqk,bkd->bqd"}> : () -> ()
    %cst_22 = arith.constant dense<0.000000e+00> : vector<2x8x8xf32>
    %58 = tpu.matmul %57, %44, %cst_22 {dimension_numbers = #tpu.dot_dimension_numbers<[2], [1], [1], [2], [0, 0, 0, 1, 1, 2], [0], [0]>} : vector<2x8x8xf32>, vector<2x8x8xf32>, vector<2x8x8xf32> -> vector<2x8x8xf32>
    "tpu.trace_stop"() : () -> ()
    %59 = vector.extract_strided_slice %37 {offsets = [0, 0, 8], sizes = [2, 8, 8], strides = [1, 1, 1]} : vector<2x8x32xf32> to vector<2x8x8xf32>
    %60 = vector.extract_strided_slice %39 {offsets = [0, 0, 8], sizes = [2, 8, 8], strides = [1, 1, 1]} : vector<2x8x32xf32> to vector<2x8x8xf32>
    %61 = vector.extract_strided_slice %41 {offsets = [0, 0, 8], sizes = [2, 8, 8], strides = [1, 1, 1]} : vector<2x8x32xf32> to vector<2x8x8xf32>
    "tpu.trace_start"() <{level = 10 : i32, message = "bqd,bkd->bqk"}> : () -> ()
    %cst_23 = arith.constant dense<0.000000e+00> : vector<2x8x8xf32>
    %62 = tpu.matmul %59, %60, %cst_23 {dimension_numbers = #tpu.dot_dimension_numbers<[2], [2], [1], [1], [0, 0, 0, 1, 1, 1], [0], [0]>} : vector<2x8x8xf32>, vector<2x8x8xf32>, vector<2x8x8xf32> -> vector<2x8x8xf32>
    "tpu.trace_stop"() : () -> ()
    %63 = vector.broadcast %26 : vector<2x1x8xf32> to vector<2x8x8xf32>
    %64 = arith.addf %62, %63 : vector<2x8x8xf32>
    %cst_24 = arith.constant dense<0xFF800000> : vector<2x8xf32>
    %65 = vector.multi_reduction <maximumf>, %64, %cst_24 [2] : vector<2x8x8xf32> to vector<2x8xf32>
    %66 = vector.shape_cast %65 : vector<2x8xf32> to vector<2x8x1xf32>
    %67 = vector.broadcast %66 : vector<2x8x1xf32> to vector<2x8x8xf32>
    %68 = arith.subf %64, %67 : vector<2x8x8xf32>
    %69 = math.exp %68 : vector<2x8x8xf32>
    %cst_25 = arith.constant dense<0.000000e+00> : vector<2x8xf32>
    %70 = vector.multi_reduction <add>, %69, %cst_25 [2] : vector<2x8x8xf32> to vector<2x8xf32>
    %71 = vector.shape_cast %70 : vector<2x8xf32> to vector<2x8x1xf32>
    %72 = tpu.reciprocal %71 {approx = true} : vector<2x8x1xf32> -> vector<2x8x1xf32>
    %73 = vector.broadcast %72 : vector<2x8x1xf32> to vector<2x8x8xf32>
    %74 = arith.mulf %69, %73 : vector<2x8x8xf32>
    "tpu.trace_start"() <{level = 10 : i32, message = "bqk,bkd->bqd"}> : () -> ()
    %cst_26 = arith.constant dense<0.000000e+00> : vector<2x8x8xf32>
    %75 = tpu.matmul %74, %61, %cst_26 {dimension_numbers = #tpu.dot_dimension_numbers<[2], [1], [1], [2], [0, 0, 0, 1, 1, 2], [0], [0]>} : vector<2x8x8xf32>, vector<2x8x8xf32>, vector<2x8x8xf32> -> vector<2x8x8xf32>
    "tpu.trace_stop"() : () -> ()
    %76 = vector.extract_strided_slice %37 {offsets = [0, 0, 16], sizes = [2, 8, 8], strides = [1, 1, 1]} : vector<2x8x32xf32> to vector<2x8x8xf32>
    %77 = vector.extract_strided_slice %39 {offsets = [0, 0, 16], sizes = [2, 8, 8], strides = [1, 1, 1]} : vector<2x8x32xf32> to vector<2x8x8xf32>
    %78 = vector.extract_strided_slice %41 {offsets = [0, 0, 16], sizes = [2, 8, 8], strides = [1, 1, 1]} : vector<2x8x32xf32> to vector<2x8x8xf32>
    "tpu.trace_start"() <{level = 10 : i32, message = "bqd,bkd->bqk"}> : () -> ()
    %cst_27 = arith.constant dense<0.000000e+00> : vector<2x8x8xf32>
    %79 = tpu.matmul %76, %77, %cst_27 {dimension_numbers = #tpu.dot_dimension_numbers<[2], [2], [1], [1], [0, 0, 0, 1, 1, 1], [0], [0]>} : vector<2x8x8xf32>, vector<2x8x8xf32>, vector<2x8x8xf32> -> vector<2x8x8xf32>
    "tpu.trace_stop"() : () -> ()
    %80 = vector.broadcast %26 : vector<2x1x8xf32> to vector<2x8x8xf32>
    %81 = arith.addf %79, %80 : vector<2x8x8xf32>
    %cst_28 = arith.constant dense<0xFF800000> : vector<2x8xf32>
    %82 = vector.multi_reduction <maximumf>, %81, %cst_28 [2] : vector<2x8x8xf32> to vector<2x8xf32>
    %83 = vector.shape_cast %82 : vector<2x8xf32> to vector<2x8x1xf32>
    %84 = vector.broadcast %83 : vector<2x8x1xf32> to vector<2x8x8xf32>
    %85 = arith.subf %81, %84 : vector<2x8x8xf32>
    %86 = math.exp %85 : vector<2x8x8xf32>
    %cst_29 = arith.constant dense<0.000000e+00> : vector<2x8xf32>
    %87 = vector.multi_reduction <add>, %86, %cst_29 [2] : vector<2x8x8xf32> to vector<2x8xf32>
    %88 = vector.shape_cast %87 : vector<2x8xf32> to vector<2x8x1xf32>
    %89 = tpu.reciprocal %88 {approx = true} : vector<2x8x1xf32> -> vector<2x8x1xf32>
    %90 = vector.broadcast %89 : vector<2x8x1xf32> to vector<2x8x8xf32>
    %91 = arith.mulf %86, %90 : vector<2x8x8xf32>
    "tpu.trace_start"() <{level = 10 : i32, message = "bqk,bkd->bqd"}> : () -> ()
    %cst_30 = arith.constant dense<0.000000e+00> : vector<2x8x8xf32>
    %92 = tpu.matmul %91, %78, %cst_30 {dimension_numbers = #tpu.dot_dimension_numbers<[2], [1], [1], [2], [0, 0, 0, 1, 1, 2], [0], [0]>} : vector<2x8x8xf32>, vector<2x8x8xf32>, vector<2x8x8xf32> -> vector<2x8x8xf32>
    "tpu.trace_stop"() : () -> ()
    %93 = vector.extract_strided_slice %37 {offsets = [0, 0, 24], sizes = [2, 8, 8], strides = [1, 1, 1]} : vector<2x8x32xf32> to vector<2x8x8xf32>
    %94 = vector.extract_strided_slice %39 {offsets = [0, 0, 24], sizes = [2, 8, 8], strides = [1, 1, 1]} : vector<2x8x32xf32> to vector<2x8x8xf32>
    %95 = vector.extract_strided_slice %41 {offsets = [0, 0, 24], sizes = [2, 8, 8], strides = [1, 1, 1]} : vector<2x8x32xf32> to vector<2x8x8xf32>
    "tpu.trace_start"() <{level = 10 : i32, message = "bqd,bkd->bqk"}> : () -> ()
    %cst_31 = arith.constant dense<0.000000e+00> : vector<2x8x8xf32>
    %96 = tpu.matmul %93, %94, %cst_31 {dimension_numbers = #tpu.dot_dimension_numbers<[2], [2], [1], [1], [0, 0, 0, 1, 1, 1], [0], [0]>} : vector<2x8x8xf32>, vector<2x8x8xf32>, vector<2x8x8xf32> -> vector<2x8x8xf32>
    "tpu.trace_stop"() : () -> ()
    %97 = vector.broadcast %26 : vector<2x1x8xf32> to vector<2x8x8xf32>
    %98 = arith.addf %96, %97 : vector<2x8x8xf32>
    %cst_32 = arith.constant dense<0xFF800000> : vector<2x8xf32>
    %99 = vector.multi_reduction <maximumf>, %98, %cst_32 [2] : vector<2x8x8xf32> to vector<2x8xf32>
    %100 = vector.shape_cast %99 : vector<2x8xf32> to vector<2x8x1xf32>
    %101 = vector.broadcast %100 : vector<2x8x1xf32> to vector<2x8x8xf32>
    %102 = arith.subf %98, %101 : vector<2x8x8xf32>
    %103 = math.exp %102 : vector<2x8x8xf32>
    %cst_33 = arith.constant dense<0.000000e+00> : vector<2x8xf32>
    %104 = vector.multi_reduction <add>, %103, %cst_33 [2] : vector<2x8x8xf32> to vector<2x8xf32>
    %105 = vector.shape_cast %104 : vector<2x8xf32> to vector<2x8x1xf32>
    %106 = tpu.reciprocal %105 {approx = true} : vector<2x8x1xf32> -> vector<2x8x1xf32>
    %107 = vector.broadcast %106 : vector<2x8x1xf32> to vector<2x8x8xf32>
    %108 = arith.mulf %103, %107 : vector<2x8x8xf32>
    "tpu.trace_start"() <{level = 10 : i32, message = "bqk,bkd->bqd"}> : () -> ()
    %cst_34 = arith.constant dense<0.000000e+00> : vector<2x8x8xf32>
    %109 = tpu.matmul %108, %95, %cst_34 {dimension_numbers = #tpu.dot_dimension_numbers<[2], [1], [1], [2], [0, 0, 0, 1, 1, 2], [0], [0]>} : vector<2x8x8xf32>, vector<2x8x8xf32>, vector<2x8x8xf32> -> vector<2x8x8xf32>
    "tpu.trace_stop"() : () -> ()
    %110 = tpu.concatenate %58, %75, %92, %109 in 2 : vector<2x8x8xf32>, vector<2x8x8xf32>, vector<2x8x8xf32>, vector<2x8x8xf32> -> vector<2x8x32xf32>
    %111 = vector.shape_cast %110 : vector<2x8x32xf32> to vector<16x32xf32>
    %c0_35 = arith.constant 0 : index
    %c0_36 = arith.constant 0 : index
    %c0_37 = arith.constant 0 : index
    %112 = vector.load %arg7[%c0_35, %c0_36, %c0_37] : memref<2x32x32xf32, #tpu.memory_space<vmem>>, vector<1x32x32xf32>
    %113 = vector.shape_cast %112 : vector<1x32x32xf32> to vector<32x32xf32>
    %cst_38 = arith.constant dense<0.000000e+00> : vector<16x32xf32>
    %114 = tpu.matmul %111, %113, %cst_38 {dimension_numbers = #tpu.dot_dimension_numbers<[1], [0], [0], [1], [0, 0, 1, 1], [], []>} : vector<16x32xf32>, vector<32x32xf32>, vector<16x32xf32> -> vector<16x32xf32>
    %c0_39 = arith.constant 0 : index
    %c0_40 = arith.constant 0 : index
    %c0_41 = arith.constant 0 : index
    %115 = vector.load %arg8[%c0_39, %c0_40, %c0_41] : memref<2x1x32xf32, #tpu.memory_space<vmem>>, vector<1x1x32xf32>
    %116 = vector.shape_cast %115 : vector<1x1x32xf32> to vector<1x32xf32>
    %117 = vector.broadcast %116 : vector<1x32xf32> to vector<16x32xf32>
    %118 = arith.addf %114, %117 : vector<16x32xf32>
    %119 = arith.addf %24, %118 : vector<16x32xf32>
    %c0_42 = arith.constant 0 : index
    %c0_43 = arith.constant 0 : index
    %c0_44 = arith.constant 0 : index
    %120 = vector.load %arg9[%c0_42, %c0_43, %c0_44] : memref<2x1x32xf32, #tpu.memory_space<vmem>>, vector<1x1x32xf32>
    %121 = vector.shape_cast %120 : vector<1x1x32xf32> to vector<1x32xf32>
    %c0_45 = arith.constant 0 : index
    %c0_46 = arith.constant 0 : index
    %c0_47 = arith.constant 0 : index
    %122 = vector.load %arg10[%c0_45, %c0_46, %c0_47] : memref<2x1x32xf32, #tpu.memory_space<vmem>>, vector<1x1x32xf32>
    %123 = vector.shape_cast %122 : vector<1x1x32xf32> to vector<1x32xf32>
    %cst_48 = arith.constant dense<0.000000e+00> : vector<16xf32>
    %124 = vector.multi_reduction <add>, %119, %cst_48 [1] : vector<16x32xf32> to vector<16xf32>
    %125 = vector.shape_cast %124 : vector<16xf32> to vector<16x1xf32>
    %cst_49 = arith.constant 3.200000e+01 : f32
    %126 = vector.broadcast %cst_49 : f32 to vector<16x1xf32>
    %127 = arith.divf %125, %126 : vector<16x1xf32>
    %128 = vector.broadcast %127 : vector<16x1xf32> to vector<16x32xf32>
    %129 = arith.subf %119, %128 : vector<16x32xf32>
    %130 = arith.mulf %129, %129 : vector<16x32xf32>
    %cst_50 = arith.constant dense<0.000000e+00> : vector<16xf32>
    %131 = vector.multi_reduction <add>, %130, %cst_50 [1] : vector<16x32xf32> to vector<16xf32>
    %132 = vector.shape_cast %131 : vector<16xf32> to vector<16x1xf32>
    %cst_51 = arith.constant 3.200000e+01 : f32
    %133 = vector.broadcast %cst_51 : f32 to vector<16x1xf32>
    %134 = arith.divf %132, %133 : vector<16x1xf32>
    %135 = vector.broadcast %127 : vector<16x1xf32> to vector<16x32xf32>
    %136 = arith.subf %119, %135 : vector<16x32xf32>
    %cst_52 = arith.constant 9.99999996E-13 : f32
    %137 = vector.broadcast %cst_52 : f32 to vector<16x1xf32>
    %138 = arith.addf %134, %137 : vector<16x1xf32>
    %139 = math.rsqrt %138 : vector<16x1xf32>
    %140 = vector.broadcast %139 : vector<16x1xf32> to vector<16x32xf32>
    %141 = arith.mulf %136, %140 : vector<16x32xf32>
    %142 = vector.broadcast %121 : vector<1x32xf32> to vector<16x32xf32>
    %143 = arith.mulf %141, %142 : vector<16x32xf32>
    %144 = vector.broadcast %123 : vector<1x32xf32> to vector<16x32xf32>
    %145 = arith.addf %143, %144 : vector<16x32xf32>
    %c0_53 = arith.constant 0 : index
    %c0_54 = arith.constant 0 : index
    %c0_55 = arith.constant 0 : index
    %146 = vector.load %arg11[%c0_53, %c0_54, %c0_55] : memref<2x32x64xf32, #tpu.memory_space<vmem>>, vector<1x32x64xf32>
    %147 = vector.shape_cast %146 : vector<1x32x64xf32> to vector<32x64xf32>
    %cst_56 = arith.constant dense<0.000000e+00> : vector<16x64xf32>
    %148 = tpu.matmul %145, %147, %cst_56 {dimension_numbers = #tpu.dot_dimension_numbers<[1], [0], [0], [1], [0, 0, 1, 1], [], []>} : vector<16x32xf32>, vector<32x64xf32>, vector<16x64xf32> -> vector<16x64xf32>
    %c0_57 = arith.constant 0 : index
    %c0_58 = arith.constant 0 : index
    %c0_59 = arith.constant 0 : index
    %149 = vector.load %arg12[%c0_57, %c0_58, %c0_59] : memref<2x1x64xf32, #tpu.memory_space<vmem>>, vector<1x1x64xf32>
    %150 = vector.shape_cast %149 : vector<1x1x64xf32> to vector<1x64xf32>
    %151 = vector.broadcast %150 : vector<1x64xf32> to vector<16x64xf32>
    %152 = arith.addf %148, %151 : vector<16x64xf32>
    %153 = arith.mulf %152, %152 : vector<16x64xf32>
    %154 = arith.mulf %152, %153 : vector<16x64xf32>
    %cst_60 = arith.constant 4.471500e-02 : f32
    %155 = vector.broadcast %cst_60 : f32 to vector<16x64xf32>
    %156 = arith.mulf %155, %154 : vector<16x64xf32>
    %157 = arith.addf %152, %156 : vector<16x64xf32>
    %cst_61 = arith.constant 0.797884583 : f32
    %158 = vector.broadcast %cst_61 : f32 to vector<16x64xf32>
    %159 = arith.mulf %158, %157 : vector<16x64xf32>
    %160 = math.tanh %159 : vector<16x64xf32>
    %cst_62 = arith.constant 1.000000e+00 : f32
    %161 = vector.broadcast %cst_62 : f32 to vector<16x64xf32>
    %162 = arith.addf %161, %160 : vector<16x64xf32>
    %cst_63 = arith.constant 5.000000e-01 : f32
    %163 = vector.broadcast %cst_63 : f32 to vector<16x64xf32>
    %164 = arith.mulf %163, %162 : vector<16x64xf32>
    %165 = arith.mulf %152, %164 : vector<16x64xf32>
    %c0_64 = arith.constant 0 : index
    %c0_65 = arith.constant 0 : index
    %c0_66 = arith.constant 0 : index
    %166 = vector.load %arg13[%c0_64, %c0_65, %c0_66] : memref<2x64x32xf32, #tpu.memory_space<vmem>>, vector<1x64x32xf32>
    %167 = vector.shape_cast %166 : vector<1x64x32xf32> to vector<64x32xf32>
    %cst_67 = arith.constant dense<0.000000e+00> : vector<16x32xf32>
    %168 = tpu.matmul %165, %167, %cst_67 {dimension_numbers = #tpu.dot_dimension_numbers<[1], [0], [0], [1], [0, 0, 1, 1], [], []>} : vector<16x64xf32>, vector<64x32xf32>, vector<16x32xf32> -> vector<16x32xf32>
    %c0_68 = arith.constant 0 : index
    %c0_69 = arith.constant 0 : index
    %c0_70 = arith.constant 0 : index
    %169 = vector.load %arg14[%c0_68, %c0_69, %c0_70] : memref<2x1x32xf32, #tpu.memory_space<vmem>>, vector<1x1x32xf32>
    %170 = vector.shape_cast %169 : vector<1x1x32xf32> to vector<1x32xf32>
    %171 = vector.broadcast %170 : vector<1x32xf32> to vector<16x32xf32>
    %172 = arith.addf %168, %171 : vector<16x32xf32>
    %173 = arith.addf %145, %172 : vector<16x32xf32>
    %c0_71 = arith.constant 0 : index
    %c0_72 = arith.constant 0 : index
    %c0_73 = arith.constant 0 : index
    %174 = vector.load %arg15[%c0_71, %c0_72, %c0_73] : memref<2x1x32xf32, #tpu.memory_space<vmem>>, vector<1x1x32xf32>
    %175 = vector.shape_cast %174 : vector<1x1x32xf32> to vector<1x32xf32>
    %c0_74 = arith.constant 0 : index
    %c0_75 = arith.constant 0 : index
    %c0_76 = arith.constant 0 : index
    %176 = vector.load %arg16[%c0_74, %c0_75, %c0_76] : memref<2x1x32xf32, #tpu.memory_space<vmem>>, vector<1x1x32xf32>
    %177 = vector.shape_cast %176 : vector<1x1x32xf32> to vector<1x32xf32>
    %cst_77 = arith.constant dense<0.000000e+00> : vector<16xf32>
    %178 = vector.multi_reduction <add>, %173, %cst_77 [1] : vector<16x32xf32> to vector<16xf32>
    %179 = vector.shape_cast %178 : vector<16xf32> to vector<16x1xf32>
    %cst_78 = arith.constant 3.200000e+01 : f32
    %180 = vector.broadcast %cst_78 : f32 to vector<16x1xf32>
    %181 = arith.divf %179, %180 : vector<16x1xf32>
    %182 = vector.broadcast %181 : vector<16x1xf32> to vector<16x32xf32>
    %183 = arith.subf %173, %182 : vector<16x32xf32>
    %184 = arith.mulf %183, %183 : vector<16x32xf32>
    %cst_79 = arith.constant dense<0.000000e+00> : vector<16xf32>
    %185 = vector.multi_reduction <add>, %184, %cst_79 [1] : vector<16x32xf32> to vector<16xf32>
    %186 = vector.shape_cast %185 : vector<16xf32> to vector<16x1xf32>
    %cst_80 = arith.constant 3.200000e+01 : f32
    %187 = vector.broadcast %cst_80 : f32 to vector<16x1xf32>
    %188 = arith.divf %186, %187 : vector<16x1xf32>
    %189 = vector.broadcast %181 : vector<16x1xf32> to vector<16x32xf32>
    %190 = arith.subf %173, %189 : vector<16x32xf32>
    %cst_81 = arith.constant 9.99999996E-13 : f32
    %191 = vector.broadcast %cst_81 : f32 to vector<16x1xf32>
    %192 = arith.addf %188, %191 : vector<16x1xf32>
    %193 = math.rsqrt %192 : vector<16x1xf32>
    %194 = vector.broadcast %193 : vector<16x1xf32> to vector<16x32xf32>
    %195 = arith.mulf %190, %194 : vector<16x32xf32>
    %196 = vector.broadcast %175 : vector<1x32xf32> to vector<16x32xf32>
    %197 = arith.mulf %195, %196 : vector<16x32xf32>
    %198 = vector.broadcast %177 : vector<1x32xf32> to vector<16x32xf32>
    %199 = arith.addf %197, %198 : vector<16x32xf32>
    %c1 = arith.constant 1 : index
    %c0_82 = arith.constant 0 : index
    %c0_83 = arith.constant 0 : index
    %200 = vector.load %arg5[%c1, %c0_82, %c0_83] : memref<2x32x96xf32, #tpu.memory_space<vmem>>, vector<1x32x96xf32>
    %201 = vector.shape_cast %200 : vector<1x32x96xf32> to vector<32x96xf32>
    %cst_84 = arith.constant dense<0.000000e+00> : vector<16x96xf32>
    %202 = tpu.matmul %199, %201, %cst_84 {dimension_numbers = #tpu.dot_dimension_numbers<[1], [0], [0], [1], [0, 0, 1, 1], [], []>} : vector<16x32xf32>, vector<32x96xf32>, vector<16x96xf32> -> vector<16x96xf32>
    %c1_85 = arith.constant 1 : index
    %c0_86 = arith.constant 0 : index
    %c0_87 = arith.constant 0 : index
    %203 = vector.load %arg6[%c1_85, %c0_86, %c0_87] : memref<2x1x96xf32, #tpu.memory_space<vmem>>, vector<1x1x96xf32>
    %204 = vector.shape_cast %203 : vector<1x1x96xf32> to vector<1x96xf32>
    %205 = vector.broadcast %204 : vector<1x96xf32> to vector<16x96xf32>
    %206 = arith.addf %202, %205 : vector<16x96xf32>
    %207 = vector.extract_strided_slice %206 {offsets = [0, 0], sizes = [16, 32], strides = [1, 1]} : vector<16x96xf32> to vector<16x32xf32>
    %cst_88 = arith.constant 0.353553385 : f32
    %208 = vector.broadcast %cst_88 : f32 to vector<16x32xf32>
    %209 = arith.mulf %207, %208 : vector<16x32xf32>
    %210 = vector.shape_cast %209 : vector<16x32xf32> to vector<2x8x32xf32>
    %211 = vector.extract_strided_slice %206 {offsets = [0, 32], sizes = [16, 32], strides = [1, 1]} : vector<16x96xf32> to vector<16x32xf32>
    %212 = vector.shape_cast %211 : vector<16x32xf32> to vector<2x8x32xf32>
    %213 = vector.extract_strided_slice %206 {offsets = [0, 64], sizes = [16, 32], strides = [1, 1]} : vector<16x96xf32> to vector<16x32xf32>
    %214 = vector.shape_cast %213 : vector<16x32xf32> to vector<2x8x32xf32>
    %215 = vector.extract_strided_slice %210 {offsets = [0, 0, 0], sizes = [2, 8, 8], strides = [1, 1, 1]} : vector<2x8x32xf32> to vector<2x8x8xf32>
    %216 = vector.extract_strided_slice %212 {offsets = [0, 0, 0], sizes = [2, 8, 8], strides = [1, 1, 1]} : vector<2x8x32xf32> to vector<2x8x8xf32>
    %217 = vector.extract_strided_slice %214 {offsets = [0, 0, 0], sizes = [2, 8, 8], strides = [1, 1, 1]} : vector<2x8x32xf32> to vector<2x8x8xf32>
    "tpu.trace_start"() <{level = 10 : i32, message = "bqd,bkd->bqk"}> : () -> ()
    %cst_89 = arith.constant dense<0.000000e+00> : vector<2x8x8xf32>
    %218 = tpu.matmul %215, %216, %cst_89 {dimension_numbers = #tpu.dot_dimension_numbers<[2], [2], [1], [1], [0, 0, 0, 1, 1, 1], [0], [0]>} : vector<2x8x8xf32>, vector<2x8x8xf32>, vector<2x8x8xf32> -> vector<2x8x8xf32>
    "tpu.trace_stop"() : () -> ()
    %219 = vector.broadcast %26 : vector<2x1x8xf32> to vector<2x8x8xf32>
    %220 = arith.addf %218, %219 : vector<2x8x8xf32>
    %cst_90 = arith.constant dense<0xFF800000> : vector<2x8xf32>
    %221 = vector.multi_reduction <maximumf>, %220, %cst_90 [2] : vector<2x8x8xf32> to vector<2x8xf32>
    %222 = vector.shape_cast %221 : vector<2x8xf32> to vector<2x8x1xf32>
    %223 = vector.broadcast %222 : vector<2x8x1xf32> to vector<2x8x8xf32>
    %224 = arith.subf %220, %223 : vector<2x8x8xf32>
    %225 = math.exp %224 : vector<2x8x8xf32>
    %cst_91 = arith.constant dense<0.000000e+00> : vector<2x8xf32>
    %226 = vector.multi_reduction <add>, %225, %cst_91 [2] : vector<2x8x8xf32> to vector<2x8xf32>
    %227 = vector.shape_cast %226 : vector<2x8xf32> to vector<2x8x1xf32>
    %228 = tpu.reciprocal %227 {approx = true} : vector<2x8x1xf32> -> vector<2x8x1xf32>
    %229 = vector.broadcast %228 : vector<2x8x1xf32> to vector<2x8x8xf32>
    %230 = arith.mulf %225, %229 : vector<2x8x8xf32>
    "tpu.trace_start"() <{level = 10 : i32, message = "bqk,bkd->bqd"}> : () -> ()
    %cst_92 = arith.constant dense<0.000000e+00> : vector<2x8x8xf32>
    %231 = tpu.matmul %230, %217, %cst_92 {dimension_numbers = #tpu.dot_dimension_numbers<[2], [1], [1], [2], [0, 0, 0, 1, 1, 2], [0], [0]>} : vector<2x8x8xf32>, vector<2x8x8xf32>, vector<2x8x8xf32> -> vector<2x8x8xf32>
    "tpu.trace_stop"() : () -> ()
    %232 = vector.extract_strided_slice %210 {offsets = [0, 0, 8], sizes = [2, 8, 8], strides = [1, 1, 1]} : vector<2x8x32xf32> to vector<2x8x8xf32>
    %233 = vector.extract_strided_slice %212 {offsets = [0, 0, 8], sizes = [2, 8, 8], strides = [1, 1, 1]} : vector<2x8x32xf32> to vector<2x8x8xf32>
    %234 = vector.extract_strided_slice %214 {offsets = [0, 0, 8], sizes = [2, 8, 8], strides = [1, 1, 1]} : vector<2x8x32xf32> to vector<2x8x8xf32>
    "tpu.trace_start"() <{level = 10 : i32, message = "bqd,bkd->bqk"}> : () -> ()
    %cst_93 = arith.constant dense<0.000000e+00> : vector<2x8x8xf32>
    %235 = tpu.matmul %232, %233, %cst_93 {dimension_numbers = #tpu.dot_dimension_numbers<[2], [2], [1], [1], [0, 0, 0, 1, 1, 1], [0], [0]>} : vector<2x8x8xf32>, vector<2x8x8xf32>, vector<2x8x8xf32> -> vector<2x8x8xf32>
    "tpu.trace_stop"() : () -> ()
    %236 = vector.broadcast %26 : vector<2x1x8xf32> to vector<2x8x8xf32>
    %237 = arith.addf %235, %236 : vector<2x8x8xf32>
    %cst_94 = arith.constant dense<0xFF800000> : vector<2x8xf32>
    %238 = vector.multi_reduction <maximumf>, %237, %cst_94 [2] : vector<2x8x8xf32> to vector<2x8xf32>
    %239 = vector.shape_cast %238 : vector<2x8xf32> to vector<2x8x1xf32>
    %240 = vector.broadcast %239 : vector<2x8x1xf32> to vector<2x8x8xf32>
    %241 = arith.subf %237, %240 : vector<2x8x8xf32>
    %242 = math.exp %241 : vector<2x8x8xf32>
    %cst_95 = arith.constant dense<0.000000e+00> : vector<2x8xf32>
    %243 = vector.multi_reduction <add>, %242, %cst_95 [2] : vector<2x8x8xf32> to vector<2x8xf32>
    %244 = vector.shape_cast %243 : vector<2x8xf32> to vector<2x8x1xf32>
    %245 = tpu.reciprocal %244 {approx = true} : vector<2x8x1xf32> -> vector<2x8x1xf32>
    %246 = vector.broadcast %245 : vector<2x8x1xf32> to vector<2x8x8xf32>
    %247 = arith.mulf %242, %246 : vector<2x8x8xf32>
    "tpu.trace_start"() <{level = 10 : i32, message = "bqk,bkd->bqd"}> : () -> ()
    %cst_96 = arith.constant dense<0.000000e+00> : vector<2x8x8xf32>
    %248 = tpu.matmul %247, %234, %cst_96 {dimension_numbers = #tpu.dot_dimension_numbers<[2], [1], [1], [2], [0, 0, 0, 1, 1, 2], [0], [0]>} : vector<2x8x8xf32>, vector<2x8x8xf32>, vector<2x8x8xf32> -> vector<2x8x8xf32>
    "tpu.trace_stop"() : () -> ()
    %249 = vector.extract_strided_slice %210 {offsets = [0, 0, 16], sizes = [2, 8, 8], strides = [1, 1, 1]} : vector<2x8x32xf32> to vector<2x8x8xf32>
    %250 = vector.extract_strided_slice %212 {offsets = [0, 0, 16], sizes = [2, 8, 8], strides = [1, 1, 1]} : vector<2x8x32xf32> to vector<2x8x8xf32>
    %251 = vector.extract_strided_slice %214 {offsets = [0, 0, 16], sizes = [2, 8, 8], strides = [1, 1, 1]} : vector<2x8x32xf32> to vector<2x8x8xf32>
    "tpu.trace_start"() <{level = 10 : i32, message = "bqd,bkd->bqk"}> : () -> ()
    %cst_97 = arith.constant dense<0.000000e+00> : vector<2x8x8xf32>
    %252 = tpu.matmul %249, %250, %cst_97 {dimension_numbers = #tpu.dot_dimension_numbers<[2], [2], [1], [1], [0, 0, 0, 1, 1, 1], [0], [0]>} : vector<2x8x8xf32>, vector<2x8x8xf32>, vector<2x8x8xf32> -> vector<2x8x8xf32>
    "tpu.trace_stop"() : () -> ()
    %253 = vector.broadcast %26 : vector<2x1x8xf32> to vector<2x8x8xf32>
    %254 = arith.addf %252, %253 : vector<2x8x8xf32>
    %cst_98 = arith.constant dense<0xFF800000> : vector<2x8xf32>
    %255 = vector.multi_reduction <maximumf>, %254, %cst_98 [2] : vector<2x8x8xf32> to vector<2x8xf32>
    %256 = vector.shape_cast %255 : vector<2x8xf32> to vector<2x8x1xf32>
    %257 = vector.broadcast %256 : vector<2x8x1xf32> to vector<2x8x8xf32>
    %258 = arith.subf %254, %257 : vector<2x8x8xf32>
    %259 = math.exp %258 : vector<2x8x8xf32>
    %cst_99 = arith.constant dense<0.000000e+00> : vector<2x8xf32>
    %260 = vector.multi_reduction <add>, %259, %cst_99 [2] : vector<2x8x8xf32> to vector<2x8xf32>
    %261 = vector.shape_cast %260 : vector<2x8xf32> to vector<2x8x1xf32>
    %262 = tpu.reciprocal %261 {approx = true} : vector<2x8x1xf32> -> vector<2x8x1xf32>
    %263 = vector.broadcast %262 : vector<2x8x1xf32> to vector<2x8x8xf32>
    %264 = arith.mulf %259, %263 : vector<2x8x8xf32>
    "tpu.trace_start"() <{level = 10 : i32, message = "bqk,bkd->bqd"}> : () -> ()
    %cst_100 = arith.constant dense<0.000000e+00> : vector<2x8x8xf32>
    %265 = tpu.matmul %264, %251, %cst_100 {dimension_numbers = #tpu.dot_dimension_numbers<[2], [1], [1], [2], [0, 0, 0, 1, 1, 2], [0], [0]>} : vector<2x8x8xf32>, vector<2x8x8xf32>, vector<2x8x8xf32> -> vector<2x8x8xf32>
    "tpu.trace_stop"() : () -> ()
    %266 = vector.extract_strided_slice %210 {offsets = [0, 0, 24], sizes = [2, 8, 8], strides = [1, 1, 1]} : vector<2x8x32xf32> to vector<2x8x8xf32>
    %267 = vector.extract_strided_slice %212 {offsets = [0, 0, 24], sizes = [2, 8, 8], strides = [1, 1, 1]} : vector<2x8x32xf32> to vector<2x8x8xf32>
    %268 = vector.extract_strided_slice %214 {offsets = [0, 0, 24], sizes = [2, 8, 8], strides = [1, 1, 1]} : vector<2x8x32xf32> to vector<2x8x8xf32>
    "tpu.trace_start"() <{level = 10 : i32, message = "bqd,bkd->bqk"}> : () -> ()
    %cst_101 = arith.constant dense<0.000000e+00> : vector<2x8x8xf32>
    %269 = tpu.matmul %266, %267, %cst_101 {dimension_numbers = #tpu.dot_dimension_numbers<[2], [2], [1], [1], [0, 0, 0, 1, 1, 1], [0], [0]>} : vector<2x8x8xf32>, vector<2x8x8xf32>, vector<2x8x8xf32> -> vector<2x8x8xf32>
    "tpu.trace_stop"() : () -> ()
    %270 = vector.broadcast %26 : vector<2x1x8xf32> to vector<2x8x8xf32>
    %271 = arith.addf %269, %270 : vector<2x8x8xf32>
    %cst_102 = arith.constant dense<0xFF800000> : vector<2x8xf32>
    %272 = vector.multi_reduction <maximumf>, %271, %cst_102 [2] : vector<2x8x8xf32> to vector<2x8xf32>
    %273 = vector.shape_cast %272 : vector<2x8xf32> to vector<2x8x1xf32>
    %274 = vector.broadcast %273 : vector<2x8x1xf32> to vector<2x8x8xf32>
    %275 = arith.subf %271, %274 : vector<2x8x8xf32>
    %276 = math.exp %275 : vector<2x8x8xf32>
    %cst_103 = arith.constant dense<0.000000e+00> : vector<2x8xf32>
    %277 = vector.multi_reduction <add>, %276, %cst_103 [2] : vector<2x8x8xf32> to vector<2x8xf32>
    %278 = vector.shape_cast %277 : vector<2x8xf32> to vector<2x8x1xf32>
    %279 = tpu.reciprocal %278 {approx = true} : vector<2x8x1xf32> -> vector<2x8x1xf32>
    %280 = vector.broadcast %279 : vector<2x8x1xf32> to vector<2x8x8xf32>
    %281 = arith.mulf %276, %280 : vector<2x8x8xf32>
    "tpu.trace_start"() <{level = 10 : i32, message = "bqk,bkd->bqd"}> : () -> ()
    %cst_104 = arith.constant dense<0.000000e+00> : vector<2x8x8xf32>
    %282 = tpu.matmul %281, %268, %cst_104 {dimension_numbers = #tpu.dot_dimension_numbers<[2], [1], [1], [2], [0, 0, 0, 1, 1, 2], [0], [0]>} : vector<2x8x8xf32>, vector<2x8x8xf32>, vector<2x8x8xf32> -> vector<2x8x8xf32>
    "tpu.trace_stop"() : () -> ()
    %283 = tpu.concatenate %231, %248, %265, %282 in 2 : vector<2x8x8xf32>, vector<2x8x8xf32>, vector<2x8x8xf32>, vector<2x8x8xf32> -> vector<2x8x32xf32>
    %284 = vector.shape_cast %283 : vector<2x8x32xf32> to vector<16x32xf32>
    %c1_105 = arith.constant 1 : index
    %c0_106 = arith.constant 0 : index
    %c0_107 = arith.constant 0 : index
    %285 = vector.load %arg7[%c1_105, %c0_106, %c0_107] : memref<2x32x32xf32, #tpu.memory_space<vmem>>, vector<1x32x32xf32>
    %286 = vector.shape_cast %285 : vector<1x32x32xf32> to vector<32x32xf32>
    %cst_108 = arith.constant dense<0.000000e+00> : vector<16x32xf32>
    %287 = tpu.matmul %284, %286, %cst_108 {dimension_numbers = #tpu.dot_dimension_numbers<[1], [0], [0], [1], [0, 0, 1, 1], [], []>} : vector<16x32xf32>, vector<32x32xf32>, vector<16x32xf32> -> vector<16x32xf32>
    %c1_109 = arith.constant 1 : index
    %c0_110 = arith.constant 0 : index
    %c0_111 = arith.constant 0 : index
    %288 = vector.load %arg8[%c1_109, %c0_110, %c0_111] : memref<2x1x32xf32, #tpu.memory_space<vmem>>, vector<1x1x32xf32>
    %289 = vector.shape_cast %288 : vector<1x1x32xf32> to vector<1x32xf32>
    %290 = vector.broadcast %289 : vector<1x32xf32> to vector<16x32xf32>
    %291 = arith.addf %287, %290 : vector<16x32xf32>
    %292 = arith.addf %199, %291 : vector<16x32xf32>
    %c1_112 = arith.constant 1 : index
    %c0_113 = arith.constant 0 : index
    %c0_114 = arith.constant 0 : index
    %293 = vector.load %arg9[%c1_112, %c0_113, %c0_114] : memref<2x1x32xf32, #tpu.memory_space<vmem>>, vector<1x1x32xf32>
    %294 = vector.shape_cast %293 : vector<1x1x32xf32> to vector<1x32xf32>
    %c1_115 = arith.constant 1 : index
    %c0_116 = arith.constant 0 : index
    %c0_117 = arith.constant 0 : index
    %295 = vector.load %arg10[%c1_115, %c0_116, %c0_117] : memref<2x1x32xf32, #tpu.memory_space<vmem>>, vector<1x1x32xf32>
    %296 = vector.shape_cast %295 : vector<1x1x32xf32> to vector<1x32xf32>
    %cst_118 = arith.constant dense<0.000000e+00> : vector<16xf32>
    %297 = vector.multi_reduction <add>, %292, %cst_118 [1] : vector<16x32xf32> to vector<16xf32>
    %298 = vector.shape_cast %297 : vector<16xf32> to vector<16x1xf32>
    %cst_119 = arith.constant 3.200000e+01 : f32
    %299 = vector.broadcast %cst_119 : f32 to vector<16x1xf32>
    %300 = arith.divf %298, %299 : vector<16x1xf32>
    %301 = vector.broadcast %300 : vector<16x1xf32> to vector<16x32xf32>
    %302 = arith.subf %292, %301 : vector<16x32xf32>
    %303 = arith.mulf %302, %302 : vector<16x32xf32>
    %cst_120 = arith.constant dense<0.000000e+00> : vector<16xf32>
    %304 = vector.multi_reduction <add>, %303, %cst_120 [1] : vector<16x32xf32> to vector<16xf32>
    %305 = vector.shape_cast %304 : vector<16xf32> to vector<16x1xf32>
    %cst_121 = arith.constant 3.200000e+01 : f32
    %306 = vector.broadcast %cst_121 : f32 to vector<16x1xf32>
    %307 = arith.divf %305, %306 : vector<16x1xf32>
    %308 = vector.broadcast %300 : vector<16x1xf32> to vector<16x32xf32>
    %309 = arith.subf %292, %308 : vector<16x32xf32>
    %cst_122 = arith.constant 9.99999996E-13 : f32
    %310 = vector.broadcast %cst_122 : f32 to vector<16x1xf32>
    %311 = arith.addf %307, %310 : vector<16x1xf32>
    %312 = math.rsqrt %311 : vector<16x1xf32>
    %313 = vector.broadcast %312 : vector<16x1xf32> to vector<16x32xf32>
    %314 = arith.mulf %309, %313 : vector<16x32xf32>
    %315 = vector.broadcast %294 : vector<1x32xf32> to vector<16x32xf32>
    %316 = arith.mulf %314, %315 : vector<16x32xf32>
    %317 = vector.broadcast %296 : vector<1x32xf32> to vector<16x32xf32>
    %318 = arith.addf %316, %317 : vector<16x32xf32>
    %c1_123 = arith.constant 1 : index
    %c0_124 = arith.constant 0 : index
    %c0_125 = arith.constant 0 : index
    %319 = vector.load %arg11[%c1_123, %c0_124, %c0_125] : memref<2x32x64xf32, #tpu.memory_space<vmem>>, vector<1x32x64xf32>
    %320 = vector.shape_cast %319 : vector<1x32x64xf32> to vector<32x64xf32>
    %cst_126 = arith.constant dense<0.000000e+00> : vector<16x64xf32>
    %321 = tpu.matmul %318, %320, %cst_126 {dimension_numbers = #tpu.dot_dimension_numbers<[1], [0], [0], [1], [0, 0, 1, 1], [], []>} : vector<16x32xf32>, vector<32x64xf32>, vector<16x64xf32> -> vector<16x64xf32>
    %c1_127 = arith.constant 1 : index
    %c0_128 = arith.constant 0 : index
    %c0_129 = arith.constant 0 : index
    %322 = vector.load %arg12[%c1_127, %c0_128, %c0_129] : memref<2x1x64xf32, #tpu.memory_space<vmem>>, vector<1x1x64xf32>
    %323 = vector.shape_cast %322 : vector<1x1x64xf32> to vector<1x64xf32>
    %324 = vector.broadcast %323 : vector<1x64xf32> to vector<16x64xf32>
    %325 = arith.addf %321, %324 : vector<16x64xf32>
    %326 = arith.mulf %325, %325 : vector<16x64xf32>
    %327 = arith.mulf %325, %326 : vector<16x64xf32>
    %cst_130 = arith.constant 4.471500e-02 : f32
    %328 = vector.broadcast %cst_130 : f32 to vector<16x64xf32>
    %329 = arith.mulf %328, %327 : vector<16x64xf32>
    %330 = arith.addf %325, %329 : vector<16x64xf32>
    %cst_131 = arith.constant 0.797884583 : f32
    %331 = vector.broadcast %cst_131 : f32 to vector<16x64xf32>
    %332 = arith.mulf %331, %330 : vector<16x64xf32>
    %333 = math.tanh %332 : vector<16x64xf32>
    %cst_132 = arith.constant 1.000000e+00 : f32
    %334 = vector.broadcast %cst_132 : f32 to vector<16x64xf32>
    %335 = arith.addf %334, %333 : vector<16x64xf32>
    %cst_133 = arith.constant 5.000000e-01 : f32
    %336 = vector.broadcast %cst_133 : f32 to vector<16x64xf32>
    %337 = arith.mulf %336, %335 : vector<16x64xf32>
    %338 = arith.mulf %325, %337 : vector<16x64xf32>
    %c1_134 = arith.constant 1 : index
    %c0_135 = arith.constant 0 : index
    %c0_136 = arith.constant 0 : index
    %339 = vector.load %arg13[%c1_134, %c0_135, %c0_136] : memref<2x64x32xf32, #tpu.memory_space<vmem>>, vector<1x64x32xf32>
    %340 = vector.shape_cast %339 : vector<1x64x32xf32> to vector<64x32xf32>
    %cst_137 = arith.constant dense<0.000000e+00> : vector<16x32xf32>
    %341 = tpu.matmul %338, %340, %cst_137 {dimension_numbers = #tpu.dot_dimension_numbers<[1], [0], [0], [1], [0, 0, 1, 1], [], []>} : vector<16x64xf32>, vector<64x32xf32>, vector<16x32xf32> -> vector<16x32xf32>
    %c1_138 = arith.constant 1 : index
    %c0_139 = arith.constant 0 : index
    %c0_140 = arith.constant 0 : index
    %342 = vector.load %arg14[%c1_138, %c0_139, %c0_140] : memref<2x1x32xf32, #tpu.memory_space<vmem>>, vector<1x1x32xf32>
    %343 = vector.shape_cast %342 : vector<1x1x32xf32> to vector<1x32xf32>
    %344 = vector.broadcast %343 : vector<1x32xf32> to vector<16x32xf32>
    %345 = arith.addf %341, %344 : vector<16x32xf32>
    %346 = arith.addf %318, %345 : vector<16x32xf32>
    %c1_141 = arith.constant 1 : index
    %c0_142 = arith.constant 0 : index
    %c0_143 = arith.constant 0 : index
    %347 = vector.load %arg15[%c1_141, %c0_142, %c0_143] : memref<2x1x32xf32, #tpu.memory_space<vmem>>, vector<1x1x32xf32>
    %348 = vector.shape_cast %347 : vector<1x1x32xf32> to vector<1x32xf32>
    %c1_144 = arith.constant 1 : index
    %c0_145 = arith.constant 0 : index
    %c0_146 = arith.constant 0 : index
    %349 = vector.load %arg16[%c1_144, %c0_145, %c0_146] : memref<2x1x32xf32, #tpu.memory_space<vmem>>, vector<1x1x32xf32>
    %350 = vector.shape_cast %349 : vector<1x1x32xf32> to vector<1x32xf32>
    %cst_147 = arith.constant dense<0.000000e+00> : vector<16xf32>
    %351 = vector.multi_reduction <add>, %346, %cst_147 [1] : vector<16x32xf32> to vector<16xf32>
    %352 = vector.shape_cast %351 : vector<16xf32> to vector<16x1xf32>
    %cst_148 = arith.constant 3.200000e+01 : f32
    %353 = vector.broadcast %cst_148 : f32 to vector<16x1xf32>
    %354 = arith.divf %352, %353 : vector<16x1xf32>
    %355 = vector.broadcast %354 : vector<16x1xf32> to vector<16x32xf32>
    %356 = arith.subf %346, %355 : vector<16x32xf32>
    %357 = arith.mulf %356, %356 : vector<16x32xf32>
    %cst_149 = arith.constant dense<0.000000e+00> : vector<16xf32>
    %358 = vector.multi_reduction <add>, %357, %cst_149 [1] : vector<16x32xf32> to vector<16xf32>
    %359 = vector.shape_cast %358 : vector<16xf32> to vector<16x1xf32>
    %cst_150 = arith.constant 3.200000e+01 : f32
    %360 = vector.broadcast %cst_150 : f32 to vector<16x1xf32>
    %361 = arith.divf %359, %360 : vector<16x1xf32>
    %362 = vector.broadcast %354 : vector<16x1xf32> to vector<16x32xf32>
    %363 = arith.subf %346, %362 : vector<16x32xf32>
    %cst_151 = arith.constant 9.99999996E-13 : f32
    %364 = vector.broadcast %cst_151 : f32 to vector<16x1xf32>
    %365 = arith.addf %361, %364 : vector<16x1xf32>
    %366 = math.rsqrt %365 : vector<16x1xf32>
    %367 = vector.broadcast %366 : vector<16x1xf32> to vector<16x32xf32>
    %368 = arith.mulf %363, %367 : vector<16x32xf32>
    %369 = vector.broadcast %348 : vector<1x32xf32> to vector<16x32xf32>
    %370 = arith.mulf %368, %369 : vector<16x32xf32>
    %371 = vector.broadcast %350 : vector<1x32xf32> to vector<16x32xf32>
    %372 = arith.addf %370, %371 : vector<16x32xf32>
    %373 = vector.shape_cast %372 : vector<16x32xf32> to vector<2x8x32xf32>
    %374 = vector.extract_strided_slice %373 {offsets = [0, 0, 0], sizes = [2, 1, 32], strides = [1, 1, 1]} : vector<2x8x32xf32> to vector<2x1x32xf32>
    %375 = vector.shape_cast %374 : vector<2x1x32xf32> to vector<2x32xf32>
    %c0_152 = arith.constant 0 : index
    %c0_153 = arith.constant 0 : index
    %376 = vector.load %arg17[%c0_152, %c0_153] : memref<32x32xf32, #tpu.memory_space<vmem>>, vector<32x32xf32>
    %cst_154 = arith.constant dense<0.000000e+00> : vector<2x32xf32>
    %377 = tpu.matmul %375, %376, %cst_154 {dimension_numbers = #tpu.dot_dimension_numbers<[1], [0], [0], [1], [0, 0, 1, 1], [], []>} : vector<2x32xf32>, vector<32x32xf32>, vector<2x32xf32> -> vector<2x32xf32>
    %c0_155 = arith.constant 0 : index
    %c0_156 = arith.constant 0 : index
    %378 = vector.load %arg18[%c0_155, %c0_156] : memref<1x32xf32, #tpu.memory_space<vmem>>, vector<1x32xf32>
    %379 = vector.broadcast %378 : vector<1x32xf32> to vector<2x32xf32>
    %380 = arith.addf %377, %379 : vector<2x32xf32>
    %381 = math.tanh %380 : vector<2x32xf32>
    %c0_157 = arith.constant 0 : index
    %c0_158 = arith.constant 0 : index
    %382 = vector.load %arg19[%c0_157, %c0_158] : memref<2x32xf32, #tpu.memory_space<vmem>>, vector<2x32xf32>
    tpu.vector_store %arg19[%c0_157, %c0_158], %381 {strides = array<i32>} : memref<2x32xf32, #tpu.memory_space<vmem>>, vector<2x32xf32>,
    return
  }
  func.func @transform_0(%arg0: i32) -> (i32, i32) {
    %c0_i32 = arith.constant 0 : i32
    %c0_i32_0 = arith.constant 0 : i32
    %c0_i32_1 = arith.constant 0 : i32
    return %c0_i32, %c0_i32_0 : i32, i32
  }
  func.func @transform_1(%arg0: i32) -> (i32, i32) {
    %c0_i32 = arith.constant 0 : i32
    %c0_i32_0 = arith.constant 0 : i32
    %c0_i32_1 = arith.constant 0 : i32
    return %c0_i32, %c0_i32_0 : i32, i32
  }
  func.func @transform_2(%arg0: i32) -> (i32, i32) {
    %c0_i32 = arith.constant 0 : i32
    %c0_i32_0 = arith.constant 0 : i32
    %c0_i32_1 = arith.constant 0 : i32
    return %c0_i32, %c0_i32_0 : i32, i32
  }
  func.func @transform_3(%arg0: i32) -> (i32, i32) {
    %c0_i32 = arith.constant 0 : i32
    %c0_i32_0 = arith.constant 0 : i32
    %c0_i32_1 = arith.constant 0 : i32
    return %c0_i32, %c0_i32_0 : i32, i32
  }
  func.func @transform_4(%arg0: i32) -> (i32, i32, i32) {
    %c0_i32 = arith.constant 0 : i32
    %c0_i32_0 = arith.constant 0 : i32
    %c0_i32_1 = arith.constant 0 : i32
    %c0_i32_2 = arith.constant 0 : i32
    return %c0_i32, %c0_i32_0, %c0_i32_1 : i32, i32, i32
  }
  func.func @transform_5(%arg0: i32) -> (i32, i32, i32) {
    %c0_i32 = arith.constant 0 : i32
    %c0_i32_0 = arith.constant 0 : i32
    %c0_i32_1 = arith.constant 0 : i32
    %c0_i32_2 = arith.constant 0 : i32
    return %c0_i32, %c0_i32_0, %c0_i32_1 : i32, i32, i32
  }
  func.func @transform_6(%arg0: i32) -> (i32, i32, i32) {
    %c0_i32 = arith.constant 0 : i32
    %c0_i32_0 = arith.constant 0 : i32
    %c0_i32_1 = arith.constant 0 : i32
    %c0_i32_2 = arith.constant 0 : i32
    return %c0_i32, %c0_i32_0, %c0_i32_1 : i32, i32, i32
  }
  func.func @transform_7(%arg0: i32) -> (i32, i32, i32) {
    %c0_i32 = arith.constant 0 : i32
    %c0_i32_0 = arith.constant 0 : i32
    %c0_i32_1 = arith.constant 0 : i32
    %c0_i32_2 = arith.constant 0 : i32
    return %c0_i32, %c0_i32_0, %c0_i32_1 : i32, i32, i32
  }
  func.func @transform_8(%arg0: i32) -> (i32, i32, i32) {
    %c0_i32 = arith.constant 0 : i32
    %c0_i32_0 = arith.constant 0 : i32
    %c0_i32_1 = arith.constant 0 : i32
    %c0_i32_2 = arith.constant 0 : i32
    return %c0_i32, %c0_i32_0, %c0_i32_1 : i32, i32, i32
  }
  func.func @transform_9(%arg0: i32) -> (i32, i32, i32) {
    %c0_i32 = arith.constant 0 : i32
    %c0_i32_0 = arith.constant 0 : i32
    %c0_i32_1 = arith.constant 0 : i32
    %c0_i32_2 = arith.constant 0 : i32
    return %c0_i32, %c0_i32_0, %c0_i32_1 : i32, i32, i32
  }
  func.func @transform_10(%arg0: i32) -> (i32, i32, i32) {
    %c0_i32 = arith.constant 0 : i32
    %c0_i32_0 = arith.constant 0 : i32
    %c0_i32_1 = arith.constant 0 : i32
    %c0_i32_2 = arith.constant 0 : i32
    return %c0_i32, %c0_i32_0, %c0_i32_1 : i32, i32, i32
  }
  func.func @transform_11(%arg0: i32) -> (i32, i32, i32) {
    %c0_i32 = arith.constant 0 : i32
    %c0_i32_0 = arith.constant 0 : i32
    %c0_i32_1 = arith.constant 0 : i32
    %c0_i32_2 = arith.constant 0 : i32
    return %c0_i32, %c0_i32_0, %c0_i32_1 : i32, i32, i32
  }
  func.func @transform_12(%arg0: i32) -> (i32, i32, i32) {
    %c0_i32 = arith.constant 0 : i32
    %c0_i32_0 = arith.constant 0 : i32
    %c0_i32_1 = arith.constant 0 : i32
    %c0_i32_2 = arith.constant 0 : i32
    return %c0_i32, %c0_i32_0, %c0_i32_1 : i32, i32, i32
  }
  func.func @transform_13(%arg0: i32) -> (i32, i32, i32) {
    %c0_i32 = arith.constant 0 : i32
    %c0_i32_0 = arith.constant 0 : i32
    %c0_i32_1 = arith.constant 0 : i32
    %c0_i32_2 = arith.constant 0 : i32
    return %c0_i32, %c0_i32_0, %c0_i32_1 : i32, i32, i32
  }
  func.func @transform_14(%arg0: i32) -> (i32, i32, i32) {
    %c0_i32 = arith.constant 0 : i32
    %c0_i32_0 = arith.constant 0 : i32
    %c0_i32_1 = arith.constant 0 : i32
    %c0_i32_2 = arith.constant 0 : i32
    return %c0_i32, %c0_i32_0, %c0_i32_1 : i32, i32, i32
  }
  func.func @transform_15(%arg0: i32) -> (i32, i32, i32) {
    %c0_i32 = arith.constant 0 : i32
    %c0_i32_0 = arith.constant 0 : i32
    %c0_i32_1 = arith.constant 0 : i32
    %c0_i32_2 = arith.constant 0 : i32
    return %c0_i32, %c0_i32_0, %c0_i32_1 : i32, i32, i32
  }
  func.func @transform_16(%arg0: i32) -> (i32, i32) {
    %c0_i32 = arith.constant 0 : i32
    %c0_i32_0 = arith.constant 0 : i32
    %c0_i32_1 = arith.constant 0 : i32
    return %c0_i32, %c0_i32_0 : i32, i32
  }
  func.func @transform_17(%arg0: i32) -> (i32, i32) {
    %c0_i32 = arith.constant 0 : i32
    %c0_i32_0 = arith.constant 0 : i32
    %c0_i32_1 = arith.constant 0 : i32
    return %c0_i32, %c0_i32_0 : i32, i32
  }
  func.func @transform_18(%arg0: i32) -> (i32, i32) {
    %c0_i32 = arith.constant 0 : i32
    %c0_i32_0 = arith.constant 0 : i32
    %c0_i32_1 = arith.constant 0 : i32
    return %c0_i32, %c0_i32_0 : i32, i32
  }
}

</mosaic_0001>

<bundles_post_ra>
// kernel: model_forward.1
= control target key start
LH: loop header
LB: loop body
LE: loop exit
PB: predicated region body
PF: predicated region fallthrough
CT: control target
= control target key end

     0   :  { %vm63_vm0 = vcmask 261120   ;;  %v4631_v36 = vmov 0.0   ;;  %vm4632_vm1 = vmmov 0   ;;  %s4633_s19 = smov 96   ;;  %vm238_vm2 = vcmask 64512   ;;  %s4636_s22 = smov 88   ;;  %s5360_s0 = inlined_call_operand.vmem [shape: f32[16,32], index: 0, kind: input, shape index: {}]   ;;  %s5361_s4 = inlined_call_operand.vmem [shape: f32[2,32,96], index: 4, kind: input, shape index: {}]   ;;  %s5362_s2 = inlined_call_operand.vmem [shape: f32[1,32], index: 2, kind: input, shape index: {}]   ;;  %s5363_s3 = inlined_call_operand.vmem [shape: f32[1,32], index: 3, kind: input, shape index: {}]   ;;  %s5364_s5 = inlined_call_operand.vmem [shape: f32[2,1,96], index: 5, kind: input, shape index: {}]   ;;  %s5365_s1 = inlined_call_operand.vmem [shape: f32[2,8], index: 1, kind: input, shape index: {}]   ;;  %s5366_s6 = inlined_call_operand.vmem [shape: f32[2,32,32], index: 6, kind: input, shape index: {}]   ;;  %s5367_s7 = inlined_call_operand.vmem [shape: f32[2,1,32], index: 7, kind: input, shape index: {}]   ;;  %s5368_s10 = inlined_call_operand.vmem [shape: f32[2,32,64], index: 10, kind: input, shape index: {}]   ;;  %s5369_s8 = inlined_call_operand.vmem [shape: f32[2,1,32], index: 8, kind: input, shape index: {}]   ;;  %s5370_s9 = inlined_call_operand.vmem [shape: f32[2,1,32], index: 9, kind: input, shape index: {}]   ;;  %s5371_s12 = inlined_call_operand.vmem [shape: f32[2,64,32], index: 12, kind: input, shape index: {}]   ;;  %s5372_s11 = inlined_call_operand.vmem [shape: f32[2,1,64], index: 11, kind: input, shape index: {}]   ;;  %s5373_s13 = inlined_call_operand.vmem [shape: f32[2,1,32], index: 13, kind: input, shape index: {}]   ;;  %s5374_s14 = inlined_call_operand.vmem [shape: f32[2,1,32], index: 14, kind: input, shape index: {}]   ;;  %s5375_s15 = inlined_call_operand.vmem [shape: f32[2,1,32], index: 15, kind: input, shape index: {}]   ;;  %s5376_s16 = inlined_call_operand.vmem [shape: f32[32,32], index: 16, kind: input, shape index: {}]   ;;  %s5377_s17 = inlined_call_operand.vmem [shape: f32[1,32], index: 17, kind: input, shape index: {}]   ;;  %s5378_s18 = inlined_call_operand.vmem [shape: f32[2,32], index: 18, kind: output, shape index: {}]  }
   0x1   :  { %5393 = sst [smem:[#allocation2_spill]] %s5360_s0  ;;  %v3921_v29 = vld [vmem:[%s5363_s3] ss:$0 sm:$0xff]  ;;  %4169 = vmatprep.subr.mxu1 %v4631_v36  ;;  %4171 = vmatprep.mubr.msk.f32.mxu1 %vm4632_vm1, %v4631_v36  ;;  %v4634_v46 = vmov 1966171168   ;;  %v120_v48 = vlaneseq  ;;  %s4638_s23 = smov 56  }
   0x2   :  { %5394 = sst [smem:[#allocation3_spill]] %s5361_s4  ;;  %s5396_s29 = sld [smem:[#allocation2_spill]]  ;;  %v3923_v37 = vld [vmem:[%s5364_s5] ss:$0 sm:$0xff]  ;;  %v118_v47 = vunpack.c.l.s4 %v4634_v46  ;;  %vm1585_vm3 = vcmask 195584   ;;  %vm1582_vm4 = vcmask 130048  }
   0x3   :  { %5395 = sst [smem:[#allocation4_spill]] %s5362_s2  ;;  %s5397_s20 = sld [smem:[#allocation3_spill]]  ;;  %v121_v50 = vshrl.u32 %v120_v48, 7  ;;  %vm1851_vm5 = vcmask 523264   ;;  %vm3839_vm6 = vcmask 1041409   ;;  %vm3914_vm7 = vcmask 254976  }
   0x4   :  { %s5398_s28 = sld [smem:[#allocation4_spill]]  ;;  %v119_v49 = vunpack.c.0.s8 %v118_v47  ;;  %v3922_v52 = vld.sshfl [vmem:[%s5365_s1] sm:$0x11 pattern:$0x75316420]  ;;  %s4635_s1 = smov 64  }
   0x5   :  { %v227_v54 = vsub.s32 0, %v121_v50  ;;  %v116_v55 = vcombine.high %v3922_v52, %v3922_v52  ;;  %s4637_s2 = smov 120   ;;  %s4639_s24 = smov 80  }
   0x6   :  { %v122_v51 = vsub.s32 %v119_v49, %v121_v50  ;;  %s4640_s25 = smov 112   ;;  %s4641_s26 = smov 48  }
   0x7   :  { %s5389_s27 = smov 72   ;;  %s5383_s30 = smov 8  }
   0x8   :  { %v59_v0 = vld [vmem:[%s5396_s29] sm:$0xff]  ;;  %v60_v1 = vld [vmem:[%s5396_s29 + $0x8] sm:$0xff]  ;;  %v123_v53 = vrot.slane %v3922_v52, %v122_v51  ;;  %v130_v57 = vrot.slane %v116_v55, %v122_v51  ;;  %s5385_s29 = smov 40   ;;  %s5381_s3 = smov 16  }
   0x9   :  { %v64_v2 = vsel %vm63_vm0, %v59_v0, 0.0  ;;  %v67_v3 = vsel %vm63_vm0, %v60_v1, 0.0  ;;  %v131_v14 = vld [vmem:[%s5397_s20] sm:$0xff]  ;;  %v132_v15 = vld [vmem:[%s5397_s20 + $0x8] sm:$0xff]  ;;  %v133_v16 = vld [vmem:[%s5397_s20 + $0x10] sm:$0xff]  ;;  %s5391_s0 = smov 24  }
   0xa   :  { %65 = vadd.xlane.f32.xlu0 %v64_v2  ;;  %v4433_v17 = vpack.c.bf16 %v132_v15, %v131_v14  ;;  %v134_v18 = vld [vmem:[%s5397_s20 + $0x18] sm:$0xff]  ;;  %v3920_v27 = vld [vmem:[%s5398_s28] ss:$0 sm:$0xff]  ;;  %v4818_v56 = vrot.slane %v123_v53, %v227_v54  ;;  %v4821_v61 = vrot.slane %v130_v57, %v227_v54  ;;  %s5387_s28 = smov 104  }
   0xb   :  { %v4437_v19 = vpack.c.bf16 %v134_v18, %v133_v16 }
   0xc   :  { %4434 = vmatprep.subr.bf16.mxu0 %v4433_v17 }
   0xd   :  { %4436 = vmatpush3.bf16.msra.mxu0 %v4433_v17 }
   0xe   :  { %68 = vadd.xlane.f32.xlu0 %v67_v3  ;;  %4438 = vmatprep.subr.bf16.mxu0 %v4437_v19 }
  0x11   :  { %4440 = vmatpush3.bf16.msra.mxu0 %v4437_v19 }
  0x12   :  { %4189 = vmatprep.subr.mxu0 %v4631_v36 }
  0x97   :  { %v66_v4 = vpop.xlane.xlu0 %65 }
  0x98   :  { %v71_v5 = vmul.f32 0.03125, %v66_v4 }
  0x9a   :  { %v73_v6 = vsub.f32 %v59_v0, %v71_v5 }
  0x9b   :  { %v69_v7 = vpop.xlane.xlu0 %68 }
  0x9c   :  { %v72_v8 = vmul.f32 0.03125, %v69_v7  ;;  %v75_v9 = vmul.f32 %v73_v6, %v73_v6 }
  0x9e   :  { %v74_v10 = vsub.f32 %v60_v1, %v72_v8  ;;  %v77_v11 = vsel %vm63_vm0, %v75_v9, 0.0 }
  0x9f   :  { %78 = vadd.xlane.f32.xlu1 %v77_v11 }
  0xa0   :  { %v76_v12 = vmul.f32 %v74_v10, %v74_v10 }
  0xa2   :  { %v80_v13 = vsel %vm63_vm0, %v76_v12, 0.0 }
  0xa3   :  { %81 = vadd.xlane.f32.xlu1 %v80_v13 }
 0x12c   :  { %v79_v20 = vpop.xlane.xlu1 %78 }
 0x12d   :  { %v83_v21 = vmul.f32 0.03125, %v79_v20 }
 0x12f   :  { %v85_v22 = vadd.f32 1e-12, %v83_v21 }
 0x130   :  { %v82_v23 = vpop.xlane.xlu1 %81 }
 0x131   :  { %4537 = vrsqrt.f32 %v85_v22  ;;  %v84_v24 = vmul.f32 0.03125, %v82_v23 }
 0x133   :  { %v86_v25 = vadd.f32 1e-12, %v84_v24 }
 0x135   :  { %4539 = vrsqrt.f32 %v86_v25 }
 0x13b   :  { %v4538_v26 = vpop.eup %4537 }
 0x13c   :  { %v89_v28 = vmul.f32 %v4538_v26, %v73_v6 }
 0x13e   :  { %v97_v30 = vmul.f32 %v3920_v27, %v89_v28 }
 0x13f   :  { %v4540_v31 = vpop.eup %4539 }
 0x140   :  { %v90_v32 = vmul.f32 %v4540_v31, %v74_v10  ;;  %v4772_v33 = vadd.f32 %v3921_v29, %v97_v30 }
 0x142   :  { %v98_v34 = vmul.f32 %v3920_v27, %v90_v32  ;;  %4166 = vmatprep.mubr.msk.f32.mxu0 %vm63_vm0, %v4772_v33 }
 0x144   :  { %v4776_v35 = vadd.f32 %v3921_v29, %v98_v34 }
 0x146   :  { %4167 = vmatmul.mubr.msk.f32.vlgmr.msra.gmra.mrb[0].mxu0 %vm63_vm0, %v4776_v35 }
 0x147   :  { %4191 = vmatprep.mubr.msk.f32.mxu0 %vm4632_vm1, %v4631_v36 }
 0x219   :  { %v4168_v38 = vpop.f32.mrb[0].mxu0 }
 0x21a   :  { %v4789_v39 = vadd.f32 %v4168_v38, %v3923_v37  ;;  %v214_v40 = vpop.f32.mrb[1].mxu0 }
 0x21b   :  { %v4791_v41 = vadd.f32 %v3923_v37, %v214_v40 }
 0x21c   :  { %315 = vrot.lane.b32.xlu1 %v4789_v39, %s4633_s19  ;;  %v4808_v45 = vmul.f32 0.35355338, %v4789_v39 }
 0x21d   :  { %236 = vrot.lane.b32.xlu0 %v4791_v41, %s4633_s19  ;;  %v4799_v43 = vmul.f32 0.35355338, %v4791_v41 }
 0x28e   :  { %v316_v44 = vpop.permute.xlu1 %315 }
 0x28f   :  { %v237_v42 = vpop.permute.xlu0 %236 }
 0x290   :  { %4170 = vmatpush3.xpose.msk.msra.mxu1 %vm238_vm2, %v237_v42 }
 0x291   :  { %4174 = vmatprep.subr.mxu1 %v4631_v36 }
 0x293   :  { %4172 = vmatmul.mubr.msk.f32.vlgmr.msra.gmra.mrb[0].mxu1 %vm238_vm2, %v4799_v43 }
 0x294   :  { %4175 = vmatpush3.xpose.msk.msra.mxu1 %vm238_vm2, %v316_v44  ;;  %4176 = vmatprep.mubr.msk.f32.mxu1 %vm4632_vm1, %v4631_v36 }
 0x295   :  { %4179 = vmatprep.subr.mxu1 %v4631_v36 }
 0x297   :  { %4177 = vmatmul.mubr.msk.f32.vlgmr.msra.gmra.mrb[2].mxu1 %vm238_vm2, %v4808_v45 }
 0x298   :  { %4181 = vmatprep.mubr.msk.f32.mxu1 %vm4632_vm1, %v4631_v36 }
 0x366   :  { %v310_v58 = vpop.f32.mrb[0].mxu1 }
 0x367   :  { %v311_v59 = vadd.f32 %v310_v58, %v4818_v56  ;;  %v4173_v60 = vpop.f32.mrb[1].mxu1 }
 0x369   :  { %v392_v62 = vsel %vm238_vm2, %v311_v59, -inf }
 0x36a   :  { %393 = vmax.xlane.f32.xlu1 %v392_v62  ;;  %v388_v63 = vpop.f32.mrb[2].mxu1 }
 0x36b   :  { %v389_v0 = vadd.f32 %v388_v63, %v4821_v61  ;;  %v4178_v1 = vpop.f32.mrb[3].mxu1 }
 0x36d   :  { %v395_v2 = vsel %vm238_vm2, %v389_v0, -inf }
 0x36e   :  { %396 = vmax.xlane.f32.xlu0 %v395_v2 }
 0x37b   :  { %490 = vrot.lane.b32.xlu1 %v4789_v39, %s4635_s1 }
 0x37f   :  { %568 = vrot.lane.b32.xlu1 %v4791_v41, %s4636_s22 }
 0x383   :  { %646 = vrot.lane.b32.xlu1 %v4789_v39, %s4636_s22 }
 0x3f7   :  { %v394_v3 = vpop.xlane.xlu1 %393 }
 0x3f8   :  { %v398_v4 = vsub.f32 %v311_v59, %v394_v3 }
 0x3fa   :  { %v400_v5 = vmul.f32 1.442695, %v398_v4 }
 0x3fb   :  { %v491_v6 = vpop.permute.xlu1 %490  ;;  %v397_v7 = vpop.xlane.xlu0 %396 }
 0x3fc   :  { %4541 = vpow2.f32 %v400_v5  ;;  %v399_v8 = vsub.f32 %v389_v0, %v397_v7 }
 0x3fe   :  { %v402_v9 = vmul.f32 1.442695, %v399_v8 }
 0x3ff   :  { %v569_v10 = vpop.permute.xlu1 %568 }
 0x400   :  { %4543 = vpow2.f32 %v402_v9  ;;  %4190 = vmatpush3.xpose.msk.msra.mxu0 %vm238_vm2, %v569_v10 }
 0x401   :  { %4199 = vmatprep.subr.mxu0 %v4631_v36 }
 0x403   :  { %v647_v15 = vpop.permute.xlu1 %646 }
 0x406   :  { %v4542_v11 = vpop.eup %4541 }
 0x407   :  { %v404_v12 = vsel %vm238_vm2, %v4542_v11, 0.0 }
 0x408   :  { %405 = vadd.xlane.f32.xlu0 %v404_v12 }
 0x40a   :  { %v4544_v13 = vpop.eup %4543 }
 0x40b   :  { %v407_v14 = vsel %vm238_vm2, %v4544_v13, 0.0 }
 0x40c   :  { %408 = vadd.xlane.f32.xlu1 %v407_v14 }
 0x41d   :  { %644 = vrot.lane.b32.xlu1 %v4808_v45, %s4637_s2 }
 0x41e   :  { %414 = vrot.lane.b32.xlu0 %v4791_v41, %s4635_s1 }
 0x422   :  { %566 = vrot.lane.b32.xlu0 %v4799_v43, %s4637_s2 }
 0x495   :  { %v406_v16 = vpop.xlane.xlu0 %405 }
 0x496   :  { %4545 = vrcp.f32 %v406_v16 }
 0x499   :  { %v409_v17 = vpop.xlane.xlu1 %408  ;;  %v415_v18 = vpop.permute.xlu0 %414 }
 0x49a   :  { %4547 = vrcp.f32 %v409_v17  ;;  %4180 = vmatpush3.msra.mxu1 %v415_v18 }
 0x49b   :  { %4184 = vmatprep.subr.mxu1 %v4631_v36 }
 0x49d   :  { %v567_v19 = vpop.permute.xlu0 %566  ;;  %v645_v24 = vpop.permute.xlu1 %644 }
 0x49e   :  { %4192 = vmatmul.mubr.msk.f32.vlgmr.msra.gmra.mrb[2].mxu0 %vm238_vm2, %v567_v19 }
 0x49f   :  { %4201 = vmatprep.mubr.msk.f32.mxu0 %vm4632_vm1, %v4631_v36 }
 0x4a0   :  { %v4546_v20 = vpop.eup %4545 }
 0x4a1   :  { %v412_v21 = vmul.f32 %v4546_v20, %v4542_v11 }
 0x4a3   :  { %4182 = vmatmul.mubr.msk.f32.vlgmr.msra.gmra.mrb[4].mxu1 %vm238_vm2, %v412_v21 }
 0x4a4   :  { %v4548_v22 = vpop.eup %4547  ;;  %4185 = vmatpush3.msra.mxu1 %v491_v6  ;;  %4186 = vmatprep.mubr.msk.f32.mxu1 %vm4632_vm1, %v4631_v36 }
 0x4a5   :  { %v413_v23 = vmul.f32 %v4548_v22, %v4544_v13  ;;  %4194 = vmatprep.subr.mxu1 %v4631_v36 }
 0x4a7   :  { %4187 = vmatmul.mubr.msk.f32.vlgmr.msra.gmra.mrb[6].mxu1 %vm238_vm2, %v413_v23 }
 0x4a8   :  { %4196 = vmatprep.mubr.msk.f32.mxu1 %vm4632_vm1, %v4631_v36 }
 0x4ab   :  { %4195 = vmatpush3.xpose.msk.msra.mxu1 %vm238_vm2, %v647_v15 }
 0x4ac   :  { %4204 = vmatprep.subr.mxu1 %v4631_v36 }
 0x4ae   :  { %4197 = vmatmul.mubr.msk.f32.vlgmr.msra.gmra.mrb[8].mxu1 %vm238_vm2, %v645_v24 }
 0x4af   :  { %4206 = vmatprep.mubr.msk.f32.mxu1 %vm4632_vm1, %v4631_v36 }
 0x571   :  { %v640_v25 = vpop.f32.mrb[2].mxu0 }
 0x572   :  { %v641_v26 = vadd.f32 %v640_v25, %v4818_v56  ;;  %v4193_v27 = vpop.f32.mrb[3].mxu0 }
 0x574   :  { %v722_v28 = vsel %vm238_vm2, %v641_v26, -inf }
 0x575   :  { %723 = vmax.xlane.f32.xlu0 %v722_v28 }
 0x576   :  { %v4860_v29 = vpop.f32.mrb[4].mxu1 }
 0x577   :  { %v4183_v30 = vpop.f32.mrb[5].mxu1 }
 0x57a   :  { %v4862_v31 = vpop.f32.mrb[6].mxu1 }
 0x57b   :  { %v4188_v32 = vpop.f32.mrb[7].mxu1 }
 0x581   :  { %v718_v34 = vpop.f32.mrb[8].mxu1 }
 0x582   :  { %v719_v37 = vadd.f32 %v718_v34, %v4821_v61  ;;  %v4198_v38 = vpop.f32.mrb[9].mxu1 }
 0x584   :  { %v725_v40 = vsel %vm238_vm2, %v719_v37, -inf }
 0x585   :  { %726 = vmax.xlane.f32.xlu1 %v725_v40 }
 0x596   :  { %820 = vrot.lane.b32.xlu1 %v4789_v39, %s4638_s23 }
 0x59a   :  { %898 = vrot.lane.b32.xlu1 %v4791_v41, %s4639_s24 }
 0x59e   :  { %976 = vrot.lane.b32.xlu1 %v4789_v39, %s4639_s24 }
 0x5a2   :  { %974 = vrot.lane.b32.xlu1 %v4808_v45, %s4640_s25 }
 0x602   :  { %v724_v42 = vpop.xlane.xlu0 %723 }
 0x603   :  { %v728_v44 = vsub.f32 %v641_v26, %v724_v42 }
 0x605   :  { %v730_v46 = vmul.f32 1.442695, %v728_v44 }
 0x607   :  { %4549 = vpow2.f32 %v730_v46 }
 0x611   :  { %v4550_v47 = vpop.eup %4549 }
 0x612   :  { %v727_v48 = vpop.xlane.xlu1 %726  ;;  %v734_v49 = vsel %vm238_vm2, %v4550_v47, 0.0 }
 0x613   :  { %735 = vadd.xlane.f32.xlu0 %v734_v49  ;;  %v729_v51 = vsub.f32 %v719_v37, %v727_v48 }
 0x615   :  { %v732_v52 = vmul.f32 1.442695, %v729_v51 }
 0x616   :  { %v821_v50 = vpop.permute.xlu1 %820 }
 0x617   :  { %4205 = vmatpush3.msra.mxu1 %v821_v50  ;;  %4551 = vpow2.f32 %v732_v52 }
 0x618   :  { %4214 = vmatprep.subr.mxu1 %v4631_v36 }
 0x61a   :  { %v899_v60 = vpop.permute.xlu1 %898 }
 0x61e   :  { %v977_v1 = vpop.permute.xlu1 %976 }
 0x621   :  { %v4552_v53 = vpop.eup %4551 }
 0x622   :  { %v737_v54 = vsel %vm238_vm2, %v4552_v53, 0.0  ;;  %v975_v3 = vpop.permute.xlu1 %974 }
 0x629   :  { %744 = vrot.lane.b32.xlu0 %v4791_v41, %s4638_s23 }
 0x648   :  { %738 = vadd.xlane.f32.xlu0 %v737_v54 }
 0x65e   :  { %896 = vrot.lane.b32.xlu0 %v4799_v43, %s4640_s25 }
 0x6a0   :  { %v736_v55 = vpop.xlane.xlu0 %735 }
 0x6a1   :  { %4553 = vrcp.f32 %v736_v55 }
 0x6a4   :  { %v745_v57 = vpop.permute.xlu0 %744 }
 0x6a5   :  { %4200 = vmatpush3.msra.mxu0 %v745_v57 }
 0x6a6   :  { %4209 = vmatprep.subr.mxu0 %v4631_v36 }
 0x6ab   :  { %v4554_v58 = vpop.eup %4553 }
 0x6ac   :  { %v742_v59 = vmul.f32 %v4554_v58, %v4550_v47 }
 0x6ae   :  { %4202 = vmatmul.mubr.msk.f32.vlgmr.msra.gmra.mrb[4].mxu0 %vm238_vm2, %v742_v59 }
 0x6af   :  { %4210 = vmatpush3.xpose.msk.msra.mxu0 %vm238_vm2, %v899_v60  ;;  %4211 = vmatprep.mubr.msk.f32.mxu0 %vm4632_vm1, %v4631_v36 }
 0x6b0   :  { %4219 = vmatprep.subr.mxu0 %v4631_v36 }
 0x6d5   :  { %v739_v62 = vpop.xlane.xlu0 %738 }
 0x6d6   :  { %4555 = vrcp.f32 %v739_v62 }
 0x6d9   :  { %v897_v63 = vpop.permute.xlu0 %896 }
 0x6da   :  { %4212 = vmatmul.mubr.msk.f32.vlgmr.msra.gmra.mrb[6].mxu0 %vm238_vm2, %v897_v63 }
 0x6db   :  { %4221 = vmatprep.mubr.msk.f32.mxu0 %vm4632_vm1, %v4631_v36 }
 0x6e0   :  { %v4556_v0 = vpop.eup %4555 }
 0x6e1   :  { %v743_v2 = vmul.f32 %v4556_v0, %v4552_v53 }
 0x6e3   :  { %4207 = vmatmul.mubr.msk.f32.vlgmr.msra.gmra.mrb[10].mxu1 %vm238_vm2, %v743_v2 }
 0x6e4   :  { %4215 = vmatpush3.xpose.msk.msra.mxu1 %vm238_vm2, %v977_v1  ;;  %4216 = vmatprep.mubr.msk.f32.mxu1 %vm4632_vm1, %v4631_v36 }
 0x6e5   :  { %4224 = vmatprep.subr.mxu1 %v4631_v36 }
 0x6e7   :  { %4217 = vmatmul.mubr.msk.f32.vlgmr.msra.gmra.mrb[12].mxu1 %vm238_vm2, %v975_v3 }
 0x6e8   :  { %4226 = vmatprep.mubr.msk.f32.mxu1 %vm4632_vm1, %v4631_v36 }
 0x781   :  { %v4898_v4 = vpop.f32.mrb[4].mxu0 }
 0x782   :  { %v4203_v5 = vpop.f32.mrb[5].mxu0 }
 0x7ad   :  { %v970_v6 = vpop.f32.mrb[6].mxu0 }
 0x7ae   :  { %v971_v7 = vadd.f32 %v970_v6, %v4818_v56  ;;  %v4213_v8 = vpop.f32.mrb[7].mxu0 }
 0x7b0   :  { %v1052_v9 = vsel %vm238_vm2, %v971_v7, -inf }
 0x7b1   :  { %1053 = vmax.xlane.f32.xlu0 %v1052_v9 }
 0x7b6   :  { %v4902_v10 = vpop.f32.mrb[10].mxu1 }
 0x7b7   :  { %v4208_v11 = vpop.f32.mrb[11].mxu1 }
 0x7ba   :  { %v1048_v12 = vpop.f32.mrb[12].mxu1 }
 0x7bb   :  { %v1049_v13 = vadd.f32 %v1048_v12, %v4821_v61  ;;  %v4218_v14 = vpop.f32.mrb[13].mxu1  ;;  %v1589_v12 = vld [vmem:[%s5366_s6 + $0x8] sm:$0xff] }
 0x7bc   :  { %v1590_v14 = vld [vmem:[%s5366_s6 + $0x10] sm:$0xff] }
 0x7bd   :  { %v1055_v15 = vsel %vm238_vm2, %v1049_v13, -inf }
 0x7be   :  { %1056 = vmax.xlane.f32.xlu1 %v1055_v15  ;;  %v1591_v15 = vld [vmem:[%s5366_s6 + $0x18] sm:$0xff] }
 0x7cf   :  { %1150 = vrot.lane.b32.xlu1 %v4789_v39, %s4641_s26 }
 0x7d3   :  { %1228 = vrot.lane.b32.xlu1 %v4791_v41, %s5389_s27 }
 0x7d7   :  { %1306 = vrot.lane.b32.xlu1 %v4789_v39, %s5389_s27 }
 0x7db   :  { %1304 = vrot.lane.b32.xlu1 %v4808_v45, %s5387_s28 }
 0x83e   :  { %v1054_v16 = vpop.xlane.xlu0 %1053 }
 0x83f   :  { %v1058_v17 = vsub.f32 %v971_v7, %v1054_v16  ;;  %v4445_v16 = vpack.c.bf16 %v1591_v15, %v1590_v14  ;;  %v1837_v14 = vld [vmem:[%s5371_s12 + $0x8] sm:$0xff] }
 0x841   :  { %v1060_v18 = vmul.f32 1.442695, %v1058_v17 }
 0x843   :  { %4557 = vpow2.f32 %v1060_v18 }
 0x84b   :  { %v1057_v19 = vpop.xlane.xlu1 %1056 }
 0x84c   :  { %v1059_v23 = vsub.f32 %v1049_v13, %v1057_v19 }
 0x84d   :  { %v4558_v20 = vpop.eup %4557 }
 0x84e   :  { %v1064_v21 = vsel %vm238_vm2, %v4558_v20, 0.0  ;;  %v1062_v24 = vmul.f32 1.442695, %v1059_v23 }
 0x84f   :  { %1065 = vadd.xlane.f32.xlu0 %v1064_v21  ;;  %v1151_v22 = vpop.permute.xlu1 %1150 }
 0x850   :  { %4225 = vmatpush3.msra.mxu1 %v1151_v22  ;;  %4559 = vpow2.f32 %v1062_v24 }
 0x851   :  { %4234 = vmatprep.subr.mxu1 %v4631_v36 }
 0x853   :  { %v1229_v32 = vpop.permute.xlu1 %1228 }
 0x857   :  { %v1307_v38 = vpop.permute.xlu1 %1306 }
 0x85a   :  { %v4560_v45 = vpop.eup %4559 }
 0x85b   :  { %v1067_v25 = vsel %vm238_vm2, %v4560_v45, 0.0  ;;  %v1305_v42 = vpop.permute.xlu1 %1304 }
 0x865   :  { %1074 = vrot.lane.b32.xlu0 %v4791_v41, %s4641_s26 }
 0x884   :  { %1068 = vadd.xlane.f32.xlu0 %v1067_v25 }
 0x89a   :  { %1226 = vrot.lane.b32.xlu0 %v4799_v43, %s5387_s28 }
 0x8dc   :  { %v1066_v26 = vpop.xlane.xlu0 %1065 }
 0x8dd   :  { %4561 = vrcp.f32 %v1066_v26 }
 0x8e0   :  { %v1075_v27 = vpop.permute.xlu0 %1074 }
 0x8e1   :  { %4220 = vmatpush3.msra.mxu0 %v1075_v27 }
 0x8e2   :  { %4229 = vmatprep.subr.mxu0 %v4631_v36 }
 0x8e7   :  { %v4562_v28 = vpop.eup %4561 }
 0x8e8   :  { %v1072_v30 = vmul.f32 %v4562_v28, %v4558_v20 }
 0x8ea   :  { %4222 = vmatmul.mubr.msk.f32.vlgmr.msra.gmra.mrb[8].mxu0 %vm238_vm2, %v1072_v30 }
 0x8eb   :  { %4230 = vmatpush3.xpose.msk.msra.mxu0 %vm238_vm2, %v1229_v32  ;;  %4231 = vmatprep.mubr.msk.f32.mxu0 %vm4632_vm1, %v4631_v36 }
 0x8ec   :  { %4239 = vmatprep.subr.mxu0 %v4631_v36 }
 0x911   :  { %v1069_v34 = vpop.xlane.xlu0 %1068 }
 0x912   :  { %4563 = vrcp.f32 %v1069_v34 }
 0x915   :  { %v1227_v43 = vpop.permute.xlu0 %1226 }
 0x916   :  { %4232 = vmatmul.mubr.msk.f32.vlgmr.msra.gmra.mrb[10].mxu0 %vm238_vm2, %v1227_v43 }
 0x917   :  { %4241 = vmatprep.mubr.msk.f32.mxu0 %vm4632_vm1, %v4631_v36 }
 0x91c   :  { %v4564_v37 = vpop.eup %4563 }
 0x91d   :  { %v1073_v40 = vmul.f32 %v4564_v37, %v4560_v45 }
 0x91f   :  { %4227 = vmatmul.mubr.msk.f32.vlgmr.msra.gmra.mrb[14].mxu1 %vm238_vm2, %v1073_v40 }
 0x920   :  { %4235 = vmatpush3.xpose.msk.msra.mxu1 %vm238_vm2, %v1307_v38  ;;  %4236 = vmatprep.mubr.msk.f32.mxu1 %vm4632_vm1, %v4631_v36 }
 0x921   :  { %4244 = vmatprep.subr.mxu1 %v4631_v36 }
 0x923   :  { %4237 = vmatmul.mubr.msk.f32.vlgmr.msra.gmra.mrb[16].mxu1 %vm238_vm2, %v1305_v42 }
 0x924   :  { %4246 = vmatprep.mubr.msk.f32.mxu1 %vm4632_vm1, %v4631_v36 }
 0x9bd   :  { %v1146_v44 = vpop.f32.mrb[8].mxu0 }
 0x9be   :  { %v4223_v46 = vpop.f32.mrb[9].mxu0 }
 0x9e9   :  { %v1300_v47 = vpop.f32.mrb[10].mxu0 }
 0x9ea   :  { %v1301_v48 = vadd.f32 %v1300_v47, %v4818_v56  ;;  %v4233_v49 = vpop.f32.mrb[11].mxu0 }
 0x9ec   :  { %v1382_v50 = vsel %vm238_vm2, %v1301_v48, -inf }
 0x9ed   :  { %1383 = vmax.xlane.f32.xlu0 %v1382_v50 }
 0x9f2   :  { %v1222_v51 = vpop.f32.mrb[14].mxu1 }
 0x9f3   :  { %v4228_v52 = vpop.f32.mrb[15].mxu1 }
 0x9f6   :  { %v1378_v53 = vpop.f32.mrb[16].mxu1 }
 0x9f7   :  { %v1379_v54 = vadd.f32 %v1378_v53, %v4821_v61  ;;  %v4238_v55 = vpop.f32.mrb[17].mxu1 }
 0x9f9   :  { %v1385_v57 = vsel %vm238_vm2, %v1379_v54, -inf }
 0x9fa   :  { %1386 = vmax.xlane.f32.xlu1 %v1385_v57  ;;  %v1727_v57 = vld [vmem:[%s5368_s10 + $0x8] sm:$0xff] }
 0xa0b   :  { %1480 = vrot.lane.b32.xlu1 %v4789_v39, %s5385_s29 }
 0xa0f   :  { %1558 = vrot.lane.b32.xlu1 %v4898_v4, %s5383_s30 }
 0xa13   :  { %1560 = vrot.lane.b32.xlu1 %v4902_v10, %s5383_s30  ;;  %s5404_s30 = smov 24  }
 0xa17   :  { %1568 = vrot.lane.b32.xlu1 %v1222_v51, %s5381_s3 }
 0xa7a   :  { %v1384_v58 = vpop.xlane.xlu0 %1383 }
 0xa7b   :  { %v1388_v59 = vsub.f32 %v1301_v48, %v1384_v58 }
 0xa7d   :  { %v1390_v60 = vmul.f32 1.442695, %v1388_v59  ;;  %v1728_v59 = vld [vmem:[%s5368_s10 + $0x10] sm:$0xff] }
 0xa7f   :  { %4565 = vpow2.f32 %v1390_v60  ;;  %v1729_v60 = vld [vmem:[%s5368_s10 + $0x18] sm:$0xff] }
 0xa87   :  { %v1387_v62 = vpop.xlane.xlu1 %1386 }
 0xa88   :  { %v1389_v63 = vsub.f32 %v1379_v54, %v1387_v62  ;;  %v4453_v62 = vpack.c.bf16 %v1729_v60, %v1728_v59 }
 0xa89   :  { %v4566_v0 = vpop.eup %4565 }
 0xa8a   :  { %v1392_v1 = vmul.f32 1.442695, %v1389_v63  ;;  %v1394_v39 = vsel %vm238_vm2, %v4566_v0, 0.0 }
 0xa8b   :  { %1395 = vadd.xlane.f32.xlu0 %v1394_v39  ;;  %v1481_v2 = vpop.permute.xlu1 %1480 }
 0xa8c   :  { %4567 = vpow2.f32 %v1392_v1  ;;  %4245 = vmatpush3.msra.mxu1 %v1481_v2 }
 0xa8f   :  { %v1559_v21 = vpop.permute.xlu1 %1558 }
 0xa90   :  { %v1580_v24 = vsel %vm238_vm2, %v4860_v29, %v1559_v21  ;;  %v3950_v29 = vld [vmem:[%s5367_s7] ss:$0 sm:$0xff] }
 0xa93   :  { %v1561_v23 = vpop.permute.xlu1 %1560 }
 0xa94   :  { %v1581_v28 = vsel %vm238_vm2, %v4862_v31, %v1561_v23  ;;  %v1843_v23 = vld [vmem:[%s5371_s12 + $0x38] sm:$0xff] }
 0xa96   :  { %v4568_v3 = vpop.eup %4567 }
 0xa97   :  { %v1397_v4 = vsel %vm238_vm2, %v4568_v3, 0.0  ;;  %v1569_v27 = vpop.permute.xlu1 %1568 }
 0xa98   :  { %1398 = vadd.xlane.f32.xlu0 %v1397_v4  ;;  %v1584_v30 = vsel %vm1582_vm4, %v1581_v28, %v1569_v27 }
 0xaae   :  { %1404 = vrot.lane.b32.xlu0 %v4791_v41, %s5385_s29  ;;  %v1588_v41 = vld [vmem:[%s5366_s6] sm:$0xff] }
 0xaaf   :  { %v4441_v13 = vpack.c.bf16 %v1589_v12, %v1588_v41 }
 0xab2   :  { %1566 = vrot.lane.b32.xlu0 %v1146_v44, %s5381_s3 }
 0xb18   :  { %v1396_v5 = vpop.xlane.xlu0 %1395 }
 0xb19   :  { %4569 = vrcp.f32 %v1396_v5  ;;  %v3953_v5 = vld [vmem:[%s5369_s8] ss:$0 sm:$0xff] }
 0xb23   :  { %v4570_v7 = vpop.eup %4569 }
 0xb24   :  { %v1402_v8 = vmul.f32 %v4570_v7, %v4566_v0  ;;  %v3954_v7 = vld [vmem:[%s5370_s9] ss:$0 sm:$0xff] }
 0xb25   :  { %v1399_v6 = vpop.xlane.xlu0 %1398 }
 0xb26   :  { %4571 = vrcp.f32 %v1399_v6 }
 0xb29   :  { %v1405_v9 = vpop.permute.xlu0 %1404 }
 0xb2a   :  { %4240 = vmatpush3.msra.mxu0 %v1405_v9 }
 0xb2b   :  { %4242 = vmatmul.mubr.msk.f32.vlgmr.msra.gmra.mrb[12].mxu0 %vm238_vm2, %v1402_v8  ;;  %4442 = vmatprep.subr.bf16.mxu0 %v4441_v13 }
 0xb2c   :  { %4444 = vmatpush3.bf16.msra.mxu0 %v4441_v13  ;;  %v1836_v13 = vld [vmem:[%s5371_s12] sm:$0xff] }
 0xb2d   :  { %4446 = vmatprep.subr.bf16.mxu0 %v4445_v16  ;;  %v1567_v22 = vpop.permute.xlu0 %1566  ;;  %v4457_v15 = vpack.c.bf16 %v1837_v14, %v1836_v13 }
 0xb2e   :  { %v1583_v45 = vsel %vm1582_vm4, %v1580_v24, %v1567_v22  ;;  %v1842_v22 = vld [vmem:[%s5371_s12 + $0x30] sm:$0xff] }
 0xb2f   :  { %v4469_v24 = vpack.c.bf16 %v1843_v23, %v1842_v22  ;;  %v3962_v23 = vld [vmem:[%s5375_s15] ss:$0 sm:$0xff] }
 0xb30   :  { %v4572_v10 = vpop.eup %4571  ;;  %4448 = vmatpush3.bf16.msra.mxu0 %v4445_v16  ;;  %v1838_v16 = vld [vmem:[%s5371_s12 + $0x10] sm:$0xff] }
 0xb31   :  { %v1403_v11 = vmul.f32 %v4572_v10, %v4568_v3  ;;  %4458 = vmatprep.subr.bf16.mxu0 %v4457_v15 }
 0xb33   :  { %4247 = vmatmul.mubr.msk.f32.vlgmr.msra.gmra.mrb[18].mxu1 %vm238_vm2, %v1403_v11 }
 0xbfe   :  { %v1476_v17 = vpop.f32.mrb[12].mxu0 }
 0xbff   :  { %1574 = vrot.lane.b32.xlu0 %v1476_v17, %s5391_s0  ;;  %v4243_v18 = vpop.f32.mrb[13].mxu0  ;;  %v1839_v17 = vld [vmem:[%s5371_s12 + $0x18] sm:$0xff] }
 0xc00   :  { %v4461_v18 = vpack.c.bf16 %v1839_v17, %v1838_v16 }
 0xc06   :  { %v1552_v19 = vpop.f32.mrb[18].mxu1 }
 0xc07   :  { %1576 = vrot.lane.b32.xlu1 %v1552_v19, %s5391_s0  ;;  %v4248_v20 = vpop.f32.mrb[19].mxu1  ;;  %v1840_v19 = vld [vmem:[%s5371_s12 + $0x20] sm:$0xff] }
 0xc08   :  { %v1841_v20 = vld [vmem:[%s5371_s12 + $0x28] sm:$0xff] }
 0xc09   :  { %v4465_v21 = vpack.c.bf16 %v1841_v20, %v1840_v19  ;;  %v3961_v19 = vld [vmem:[%s5374_s14] ss:$0 sm:$0xff] }
 0xc71   :  { %v1575_v25 = vpop.permute.xlu0 %1574 }
 0xc72   :  { %v1586_v26 = vsel %vm1585_vm3, %v1583_v45, %v1575_v25  ;;  %v3955_v45 = vld [vmem:[%s5372_s11] ss:$0 sm:$0xff] }
 0xc73   :  { %4257 = vmatprep.mubr.msk.f32.mxu0 %vm63_vm0, %v1586_v26 }
 0xc79   :  { %v1577_v32 = vpop.permute.xlu1 %1576 }
 0xc7a   :  { %v1587_v34 = vsel %vm1585_vm3, %v1584_v30, %v1577_v32 }
 0xc7b   :  { %4258 = vmatmul.mubr.msk.f32.vlgmr.msra.gmra.mrb[14].mxu0 %vm63_vm0, %v1587_v34 }
 0xc7c   :  { %4460 = vmatpush3.bf16.msra.mxu0 %v4457_v15 }
 0xc7d   :  { %4462 = vmatprep.subr.bf16.mxu0 %v4461_v18 }
 0xc80   :  { %4464 = vmatpush3.bf16.msra.mxu0 %v4461_v18 }
 0xc81   :  { %4466 = vmatprep.subr.bf16.mxu0 %v4465_v21 }
 0xc84   :  { %4468 = vmatpush3.bf16.msra.mxu0 %v4465_v21 }
 0xc85   :  { %4470 = vmatprep.subr.bf16.mxu0 %v4469_v24 }
 0xc88   :  { %4472 = vmatpush3.bf16.msra.mxu0 %v4469_v24 }
 0xc89   :  { %4311 = vmatprep.subr.mxu0 %v4631_v36 }
 0xd4e   :  { %v4259_v43 = vpop.f32.mrb[14].mxu0 }
 0xd4f   :  { %v1677_v37 = vadd.f32 %v4259_v43, %v3950_v29  ;;  %v1671_v38 = vpop.f32.mrb[15].mxu0 }
 0xd50   :  { %v1672_v40 = vadd.f32 %v3950_v29, %v1671_v38 }
 0xd51   :  { %v1681_v42 = vadd.f32 %v1677_v37, %v4776_v35 }
 0xd52   :  { %v1680_v44 = vadd.f32 %v1672_v40, %v4772_v33  ;;  %v1726_v33 = vld [vmem:[%s5368_s10] sm:$0xff] }
 0xd53   :  { %v1687_v31 = vsel %vm63_vm0, %v1681_v42, 0.0  ;;  %v4449_v58 = vpack.c.bf16 %v1727_v57, %v1726_v33 }
 0xd54   :  { %1688 = vadd.xlane.f32.xlu1 %v1687_v31  ;;  %v1684_v46 = vsel %vm63_vm0, %v1680_v44, 0.0 }
 0xd55   :  { %1685 = vadd.xlane.f32.xlu0 %v1684_v46  ;;  %4450 = vmatprep.subr.bf16.mxu1 %v4449_v58 }
 0xd56   :  { %4452 = vmatpush3.bf16.msra.mxu1 %v4449_v58 }
 0xd57   :  { %4454 = vmatprep.subr.bf16.mxu1 %v4453_v62 }
 0xd5a   :  { %4456 = vmatpush3.bf16.msra.mxu1 %v4453_v62 }
 0xde1   :  { %v1689_v47 = vpop.xlane.xlu1 %1688 }
 0xde2   :  { %v1691_v48 = vmul.f32 0.03125, %v1689_v47  ;;  %v1686_v49 = vpop.xlane.xlu0 %1685 }
 0xde3   :  { %v1690_v50 = vmul.f32 0.03125, %v1686_v49 }
 0xde4   :  { %v1693_v51 = vsub.f32 %v1681_v42, %v1691_v48 }
 0xde5   :  { %v1692_v52 = vsub.f32 %v1680_v44, %v1690_v50 }
 0xde6   :  { %v1695_v55 = vmul.f32 %v1693_v51, %v1693_v51 }
 0xde7   :  { %v1694_v53 = vmul.f32 %v1692_v52, %v1692_v52 }
 0xde8   :  { %v1699_v35 = vsel %vm63_vm0, %v1695_v55, 0.0 }
 0xde9   :  { %v1696_v54 = vsel %vm63_vm0, %v1694_v53, 0.0  ;;  %v3958_v53 = vld [vmem:[%s5373_s13] ss:$0 sm:$0xff] }
 0xdea   :  { %1697 = vadd.xlane.f32.xlu0 %v1696_v54 }
 0xdee   :  { %1700 = vadd.xlane.f32.xlu0 %v1699_v35 }
 0xe77   :  { %v1698_v63 = vpop.xlane.xlu0 %1697 }
 0xe78   :  { %v1702_v0 = vmul.f32 0.03125, %v1698_v63 }
 0xe7a   :  { %v1704_v1 = vadd.f32 1e-12, %v1702_v0 }
 0xe7b   :  { %v1701_v39 = vpop.xlane.xlu0 %1700 }
 0xe7c   :  { %4573 = vrsqrt.f32 %v1704_v1  ;;  %v1703_v2 = vmul.f32 0.03125, %v1701_v39 }
 0xe7e   :  { %v1705_v3 = vadd.f32 1e-12, %v1703_v2 }
 0xe80   :  { %4575 = vrsqrt.f32 %v1705_v3 }
 0xe86   :  { %v4574_v4 = vpop.eup %4573 }
 0xe87   :  { %v1708_v6 = vmul.f32 %v4574_v4, %v1692_v52 }
 0xe89   :  { %v1716_v8 = vmul.f32 %v3953_v5, %v1708_v6 }
 0xe8a   :  { %v4576_v9 = vpop.eup %4575 }
 0xe8b   :  { %v1709_v10 = vmul.f32 %v4576_v9, %v1693_v51  ;;  %v5007_v11 = vadd.f32 %v3954_v7, %v1716_v8  ;;  %v3964_v8 = vld [vmem:[%s5397_s20 + $0x28] sm:$0xff] }
 0xe8d   :  { %v1717_v41 = vmul.f32 %v3953_v5, %v1709_v10  ;;  %4268 = vmatprep.mubr.msk.f32.mxu1 %vm63_vm0, %v5007_v11  ;;  %v3965_v10 = vld [vmem:[%s5397_s20 + $0x30] sm:$0xff] }
 0xe8f   :  { %v1725_v12 = vadd.f32 %v3954_v7, %v1717_v41  ;;  %v3963_v7 = vld [vmem:[%s5397_s20 + $0x20] sm:$0xff] }
 0xe90   :  { %v4473_v9 = vpack.c.bf16 %v3964_v8, %v3963_v7 }
 0xe91   :  { %4269 = vmatmul.mubr.msk.f32.vlgmr.msra.gmra.mrb[20].mxu1 %vm63_vm0, %v1725_v12 }
 0xe92   :  { %4474 = vmatprep.subr.bf16.mxu1 %v4473_v9 }
 0xe93   :  { %4476 = vmatpush3.bf16.msra.mxu1 %v4473_v9 }
 0xf64   :  { %v4270_v25 = vpop.f32.mrb[20].mxu1 }
 0xf65   :  { %v1815_v26 = vadd.f32 %v4270_v25, %v3955_v45  ;;  %v1809_v27 = vpop.f32.mrb[21].mxu1 }
 0xf66   :  { %v1810_v28 = vadd.f32 %v3955_v45, %v1809_v27  ;;  %v3968_v27 = vld [vmem:[%s5364_s5 + $0x1] ss:$0 sm:$0xff]  ;;  %s5399_s5 = smov 72  }
 0xf67   :  { %v1819_v30 = vmul.f32 %v1815_v26, %v1815_v26 }
 0xf68   :  { %v1818_v32 = vmul.f32 %v1810_v28, %v1810_v28 }
 0xf69   :  { %v1821_v34 = vmul.f32 %v1819_v30, %v1815_v26 }
 0xf6a   :  { %v1820_v29 = vmul.f32 %v1818_v32, %v1810_v28 }
 0xf6b   :  { %v1823_v43 = vmul.f32 0.044715, %v1821_v34 }
 0xf6c   :  { %v1822_v37 = vmul.f32 0.044715, %v1820_v29 }
 0xf6d   :  { %v1825_v38 = vadd.f32 %v1823_v43, %v1815_v26 }
 0xf6e   :  { %v1824_v40 = vadd.f32 %v1822_v37, %v1810_v28 }
 0xf6f   :  { %v1827_v42 = vmul.f32 0.7978846, %v1825_v38 }
 0xf70   :  { %v1826_v44 = vmul.f32 0.7978846, %v1824_v40 }
 0xf71   :  { %4577 = vtanh.f32 %v1827_v42 }
 0xf72   :  { %4579 = vtanh.f32 %v1826_v44 }
 0xf7b   :  { %v4578_v31 = vpop.eup %4577 }
 0xf7c   :  { %v4580_v46 = vpop.eup %4579  ;;  %v1831_v47 = vadd.f32 1.0, %v4578_v31 }
 0xf7d   :  { %v1830_v48 = vadd.f32 1.0, %v4580_v46 }
 0xf7e   :  { %v1833_v49 = vmul.f32 0.5, %v1831_v47 }
 0xf7f   :  { %v1832_v50 = vmul.f32 0.5, %v1830_v48 }
 0xf80   :  { %v1835_v52 = vmul.f32 %v1833_v49, %v1815_v26 }
 0xf81   :  { %v1834_v51 = vmul.f32 %v1832_v50, %v1810_v28 }
 0xf83   :  { %4287 = vmatprep.mubr.msk.f32.mxu0 %vm1851_vm5, %v1834_v51 }
 0xf84   :  { %4288 = vmatmul.mubr.msk.f32.vlgmr.msra.gmra.mrb[16].mxu0 %vm1851_vm5, %v1835_v52 }
 0xf85   :  { %4313 = vmatprep.mubr.msk.f32.mxu0 %vm4632_vm1, %v4631_v36 }
0x1057   :  { %v4289_v54 = vpop.f32.mrb[16].mxu0 }
0x1058   :  { %v1930_v55 = vadd.f32 %v4289_v54, %v3958_v53  ;;  %v1924_v35 = vpop.f32.mrb[17].mxu0 }
0x1059   :  { %v1925_v33 = vadd.f32 %v3958_v53, %v1924_v35 }
0x105a   :  { %v1934_v57 = vadd.f32 %v1930_v55, %v1725_v12 }
0x105b   :  { %v1933_v58 = vadd.f32 %v1925_v33, %v5007_v11  ;;  %v3966_v11 = vld [vmem:[%s5397_s20 + $0x38] sm:$0xff] }
0x105c   :  { %v1940_v59 = vsel %vm63_vm0, %v1934_v57, 0.0  ;;  %v4477_v41 = vpack.c.bf16 %v3966_v11, %v3965_v10 }
0x105d   :  { %1941 = vadd.xlane.f32.xlu1 %v1940_v59  ;;  %v1937_v60 = vsel %vm63_vm0, %v1933_v58, 0.0 }
0x105e   :  { %1938 = vadd.xlane.f32.xlu0 %v1937_v60  ;;  %4478 = vmatprep.subr.bf16.mxu1 %v4477_v41 }
0x105f   :  { %4480 = vmatpush3.bf16.msra.mxu1 %v4477_v41 }
0x1060   :  { %4301 = vmatprep.subr.mxu1 %v4631_v36 }
0x10ea   :  { %v1942_v62 = vpop.xlane.xlu1 %1941 }
0x10eb   :  { %v1944_v63 = vmul.f32 0.03125, %v1942_v62  ;;  %v1939_v0 = vpop.xlane.xlu0 %1938 }
0x10ec   :  { %v1943_v1 = vmul.f32 0.03125, %v1939_v0 }
0x10ed   :  { %v1946_v39 = vsub.f32 %v1934_v57, %v1944_v63 }
0x10ee   :  { %v1945_v2 = vsub.f32 %v1933_v58, %v1943_v1 }
0x10ef   :  { %v1948_v3 = vmul.f32 %v1946_v39, %v1946_v39 }
0x10f0   :  { %v1947_v4 = vmul.f32 %v1945_v2, %v1945_v2 }
0x10f1   :  { %v1952_v5 = vsel %vm63_vm0, %v1948_v3, 0.0 }
0x10f2   :  { %1953 = vadd.xlane.f32.xlu1 %v1952_v5  ;;  %v1949_v6 = vsel %vm63_vm0, %v1947_v4, 0.0 }
0x10f3   :  { %1950 = vadd.xlane.f32.xlu0 %v1949_v6 }
0x117f   :  { %v1954_v12 = vpop.xlane.xlu1 %1953 }
0x1180   :  { %v1956_v13 = vmul.f32 0.03125, %v1954_v12  ;;  %v1951_v14 = vpop.xlane.xlu0 %1950 }
0x1181   :  { %v1955_v15 = vmul.f32 0.03125, %v1951_v14 }
0x1182   :  { %v1958_v16 = vadd.f32 1e-12, %v1956_v13 }
0x1183   :  { %v1957_v17 = vadd.f32 1e-12, %v1955_v15 }
0x1184   :  { %4581 = vrsqrt.f32 %v1958_v16 }
0x1185   :  { %4583 = vrsqrt.f32 %v1957_v17 }
0x118e   :  { %v4582_v18 = vpop.eup %4581 }
0x118f   :  { %v4584_v20 = vpop.eup %4583  ;;  %v1962_v21 = vmul.f32 %v4582_v18, %v1946_v39 }
0x1190   :  { %v1961_v22 = vmul.f32 %v4584_v20, %v1945_v2 }
0x1191   :  { %v1970_v24 = vmul.f32 %v3961_v19, %v1962_v21 }
0x1192   :  { %v1969_v45 = vmul.f32 %v3961_v19, %v1961_v22 }
0x1193   :  { %v5073_v26 = vadd.f32 %v3962_v23, %v1970_v24 }
0x1194   :  { %v5071_v25 = vadd.f32 %v3962_v23, %v1969_v45 }
0x1196   :  { %4298 = vmatprep.mubr.msk.f32.mxu1 %vm63_vm0, %v5071_v25 }
0x1197   :  { %4299 = vmatmul.mubr.msk.f32.vlgmr.msra.gmra.mrb[22].mxu1 %vm63_vm0, %v5073_v26 }
0x1198   :  { %4303 = vmatprep.mubr.msk.f32.mxu1 %vm4632_vm1, %v4631_v36 }
0x126a   :  { %v4300_v28 = vpop.f32.mrb[22].mxu1 }
0x126b   :  { %v5084_v30 = vadd.f32 %v4300_v28, %v3968_v27  ;;  %v2064_v32 = vpop.f32.mrb[23].mxu1 }
0x126c   :  { %v5086_v34 = vadd.f32 %v3968_v27, %v2064_v32 }
0x126d   :  { %2154 = vrot.lane.b32.xlu1 %v5084_v30, %s4633_s19  ;;  %v5103_v38 = vmul.f32 0.35355338, %v5084_v30 }
0x126e   :  { %2076 = vrot.lane.b32.xlu0 %v5086_v34, %s4633_s19  ;;  %v5094_v43 = vmul.f32 0.35355338, %v5086_v34  ;;  %s5400_s19 = smov 104  }
0x12df   :  { %v2155_v37 = vpop.permute.xlu1 %2154 }
0x12e0   :  { %v2077_v29 = vpop.permute.xlu0 %2076 }
0x12e1   :  { %4302 = vmatpush3.xpose.msk.msra.mxu1 %vm238_vm2, %v2077_v29 }
0x12e2   :  { %4306 = vmatprep.subr.mxu1 %v4631_v36 }
0x12e4   :  { %4304 = vmatmul.mubr.msk.f32.vlgmr.msra.gmra.mrb[24].mxu1 %vm238_vm2, %v5094_v43 }
0x12e5   :  { %4307 = vmatpush3.xpose.msk.msra.mxu1 %vm238_vm2, %v2155_v37  ;;  %4308 = vmatprep.mubr.msk.f32.mxu1 %vm4632_vm1, %v4631_v36 }
0x12e6   :  { %4316 = vmatprep.subr.mxu1 %v4631_v36 }
0x12e8   :  { %4309 = vmatmul.mubr.msk.f32.vlgmr.msra.gmra.mrb[26].mxu1 %vm238_vm2, %v5103_v38 }
0x12e9   :  { %4318 = vmatprep.mubr.msk.f32.mxu1 %vm4632_vm1, %v4631_v36 }
0x13b7   :  { %v2149_v40 = vpop.f32.mrb[24].mxu1 }
0x13b8   :  { %v2150_v42 = vadd.f32 %v2149_v40, %v4818_v56  ;;  %v4305_v44 = vpop.f32.mrb[25].mxu1 }
0x13ba   :  { %v2231_v31 = vsel %vm238_vm2, %v2150_v42, -inf }
0x13bb   :  { %2232 = vmax.xlane.f32.xlu1 %v2231_v31  ;;  %v2227_v46 = vpop.f32.mrb[26].mxu1 }
0x13bc   :  { %v2228_v47 = vadd.f32 %v2227_v46, %v4821_v61  ;;  %v4310_v48 = vpop.f32.mrb[27].mxu1 }
0x13be   :  { %v2234_v49 = vsel %vm238_vm2, %v2228_v47, -inf }
0x13bf   :  { %2235 = vmax.xlane.f32.xlu0 %v2234_v49 }
0x13cc   :  { %2329 = vrot.lane.b32.xlu1 %v5084_v30, %s4635_s1 }
0x13d0   :  { %2407 = vrot.lane.b32.xlu1 %v5086_v34, %s4636_s22 }
0x13d4   :  { %2485 = vrot.lane.b32.xlu1 %v5084_v30, %s4636_s22  ;;  %s5402_s22 = smov 8  }
0x13d5   :  { %2253 = vrot.lane.b32.xlu0 %v5086_v34, %s4635_s1  ;;  %s5401_s1 = smov 40  }
0x1448   :  { %v2233_v50 = vpop.xlane.xlu1 %2232 }
0x1449   :  { %v2237_v51 = vsub.f32 %v2150_v42, %v2233_v50 }
0x144b   :  { %v2239_v52 = vmul.f32 1.442695, %v2237_v51 }
0x144c   :  { %v2330_v53 = vpop.permute.xlu1 %2329  ;;  %v2236_v54 = vpop.xlane.xlu0 %2235 }
0x144d   :  { %4585 = vpow2.f32 %v2239_v52  ;;  %v2238_v55 = vsub.f32 %v2228_v47, %v2236_v54  ;;  %4317 = vmatpush3.msra.mxu1 %v2330_v53 }
0x144e   :  { %4326 = vmatprep.subr.mxu1 %v4631_v36 }
0x144f   :  { %v2241_v35 = vmul.f32 1.442695, %v2238_v55 }
0x1450   :  { %v2254_v33 = vpop.permute.xlu0 %2253  ;;  %v2408_v62 = vpop.permute.xlu1 %2407 }
0x1451   :  { %4587 = vpow2.f32 %v2241_v35  ;;  %4312 = vmatpush3.msra.mxu0 %v2254_v33 }
0x1452   :  { %4321 = vmatprep.subr.mxu0 %v4631_v36 }
0x1454   :  { %v2486_v63 = vpop.permute.xlu1 %2485 }
0x1457   :  { %v4586_v57 = vpop.eup %4585 }
0x1458   :  { %v2243_v58 = vsel %vm238_vm2, %v4586_v57, 0.0 }
0x1459   :  { %2244 = vadd.xlane.f32.xlu0 %v2243_v58 }
0x145b   :  { %v4588_v59 = vpop.eup %4587 }
0x145c   :  { %v2246_v60 = vsel %vm238_vm2, %v4588_v59, 0.0 }
0x145d   :  { %2247 = vadd.xlane.f32.xlu1 %v2246_v60 }
0x146e   :  { %2483 = vrot.lane.b32.xlu1 %v5103_v38, %s4637_s2 }
0x146f   :  { %2405 = vrot.lane.b32.xlu0 %v5094_v43, %s4637_s2  ;;  %s5403_s2 = smov 16  }
0x14e6   :  { %v2245_v0 = vpop.xlane.xlu0 %2244 }
0x14e7   :  { %4589 = vrcp.f32 %v2245_v0 }
0x14ea   :  { %v2248_v1 = vpop.xlane.xlu1 %2247  ;;  %v2406_v5 = vpop.permute.xlu0 %2405 }
0x14eb   :  { %4591 = vrcp.f32 %v2248_v1 }
0x14ee   :  { %v2484_v6 = vpop.permute.xlu1 %2483 }
0x14f1   :  { %v4590_v39 = vpop.eup %4589 }
0x14f2   :  { %v2251_v2 = vmul.f32 %v4590_v39, %v4586_v57 }
0x14f4   :  { %4314 = vmatmul.mubr.msk.f32.vlgmr.msra.gmra.mrb[18].mxu0 %vm238_vm2, %v2251_v2 }
0x14f5   :  { %v4592_v3 = vpop.eup %4591  ;;  %4322 = vmatpush3.xpose.msk.msra.mxu0 %vm238_vm2, %v2408_v62  ;;  %4323 = vmatprep.mubr.msk.f32.mxu0 %vm4632_vm1, %v4631_v36 }
0x14f6   :  { %v2252_v4 = vmul.f32 %v4592_v3, %v4588_v59  ;;  %4331 = vmatprep.subr.mxu0 %v4631_v36 }
0x14f8   :  { %4319 = vmatmul.mubr.msk.f32.vlgmr.msra.gmra.mrb[28].mxu1 %vm238_vm2, %v2252_v4  ;;  %4324 = vmatmul.mubr.msk.f32.vlgmr.msra.gmra.mrb[20].mxu0 %vm238_vm2, %v2406_v5 }
0x14f9   :  { %4327 = vmatpush3.xpose.msk.msra.mxu1 %vm238_vm2, %v2486_v63  ;;  %4328 = vmatprep.mubr.msk.f32.mxu1 %vm4632_vm1, %v4631_v36 }
0x14fa   :  { %4336 = vmatprep.subr.mxu1 %v4631_v36  ;;  %4333 = vmatprep.mubr.msk.f32.mxu0 %vm4632_vm1, %v4631_v36 }
0x14fc   :  { %4329 = vmatmul.mubr.msk.f32.vlgmr.msra.gmra.mrb[30].mxu1 %vm238_vm2, %v2484_v6 }
0x14fd   :  { %4338 = vmatprep.mubr.msk.f32.mxu1 %vm4632_vm1, %v4631_v36 }
0x15c7   :  { %v5146_v7 = vpop.f32.mrb[18].mxu0 }
0x15c8   :  { %v4315_v8 = vpop.f32.mrb[19].mxu0 }
0x15cb   :  { %v5148_v9 = vpop.f32.mrb[28].mxu1  ;;  %v2479_v10 = vpop.f32.mrb[20].mxu0 }
0x15cc   :  { %v2480_v11 = vadd.f32 %v2479_v10, %v4818_v56  ;;  %v4320_v41 = vpop.f32.mrb[29].mxu1  ;;  %v4325_v12 = vpop.f32.mrb[21].mxu0 }
0x15ce   :  { %v2561_v13 = vsel %vm238_vm2, %v2480_v11, -inf }
0x15cf   :  { %2562 = vmax.xlane.f32.xlu0 %v2561_v13  ;;  %v2557_v14 = vpop.f32.mrb[30].mxu1 }
0x15d0   :  { %v2558_v15 = vadd.f32 %v2557_v14, %v4821_v61  ;;  %v4330_v16 = vpop.f32.mrb[31].mxu1 }
0x15d2   :  { %v2564_v17 = vsel %vm238_vm2, %v2558_v15, -inf }
0x15d3   :  { %2565 = vmax.xlane.f32.xlu1 %v2564_v17 }
0x15e4   :  { %2659 = vrot.lane.b32.xlu1 %v5084_v30, %s4638_s23 }
0x15e5   :  { %2583 = vrot.lane.b32.xlu0 %v5086_v34, %s4638_s23 }
0x15e8   :  { %2737 = vrot.lane.b32.xlu1 %v5086_v34, %s4639_s24 }
0x15ec   :  { %2815 = vrot.lane.b32.xlu1 %v5084_v30, %s4639_s24 }
0x15f0   :  { %2813 = vrot.lane.b32.xlu1 %v5103_v38, %s4640_s25 }
0x165c   :  { %v2563_v18 = vpop.xlane.xlu0 %2562 }
0x165d   :  { %v2567_v19 = vsub.f32 %v2480_v11, %v2563_v18 }
0x165f   :  { %v2569_v20 = vmul.f32 1.442695, %v2567_v19 }
0x1660   :  { %v2584_v21 = vpop.permute.xlu0 %2583  ;;  %v2566_v22 = vpop.xlane.xlu1 %2565 }
0x1661   :  { %4593 = vpow2.f32 %v2569_v20  ;;  %v2568_v23 = vsub.f32 %v2558_v15, %v2566_v22  ;;  %4332 = vmatpush3.msra.mxu0 %v2584_v21 }
0x1662   :  { %4341 = vmatprep.subr.mxu0 %v4631_v36 }
0x1663   :  { %v2571_v24 = vmul.f32 1.442695, %v2568_v23 }
0x1664   :  { %v2660_v45 = vpop.permute.xlu1 %2659 }
0x1665   :  { %4595 = vpow2.f32 %v2571_v24  ;;  %4337 = vmatpush3.msra.mxu1 %v2660_v45 }
0x1666   :  { %4346 = vmatprep.subr.mxu1 %v4631_v36 }
0x1668   :  { %v2738_v42 = vpop.permute.xlu1 %2737 }
0x166b   :  { %v4594_v27 = vpop.eup %4593 }
0x166c   :  { %v2573_v28 = vsel %vm238_vm2, %v4594_v27, 0.0  ;;  %v2816_v47 = vpop.permute.xlu1 %2815 }
0x166d   :  { %2574 = vadd.xlane.f32.xlu0 %v2573_v28 }
0x166f   :  { %v4596_v32 = vpop.eup %4595 }
0x1670   :  { %v2576_v29 = vsel %vm238_vm2, %v4596_v32, 0.0  ;;  %v2814_v50 = vpop.permute.xlu1 %2813 }
0x1671   :  { %2577 = vadd.xlane.f32.xlu0 %v2576_v29 }
0x1687   :  { %2735 = vrot.lane.b32.xlu0 %v5094_v43, %s4640_s25 }
0x16fa   :  { %v2575_v37 = vpop.xlane.xlu0 %2574 }
0x16fb   :  { %4597 = vrcp.f32 %v2575_v37 }
0x16fe   :  { %v2578_v40 = vpop.xlane.xlu0 %2577 }
0x16ff   :  { %4599 = vrcp.f32 %v2578_v40 }
0x1702   :  { %v2736_v49 = vpop.permute.xlu0 %2735 }
0x1705   :  { %v4598_v44 = vpop.eup %4597 }
0x1706   :  { %v2581_v31 = vmul.f32 %v4598_v44, %v4594_v27 }
0x1708   :  { %4334 = vmatmul.mubr.msk.f32.vlgmr.msra.gmra.mrb[22].mxu0 %vm238_vm2, %v2581_v31 }
0x1709   :  { %v4600_v46 = vpop.eup %4599  ;;  %4342 = vmatpush3.xpose.msk.msra.mxu0 %vm238_vm2, %v2738_v42  ;;  %4343 = vmatprep.mubr.msk.f32.mxu0 %vm4632_vm1, %v4631_v36 }
0x170a   :  { %v2582_v48 = vmul.f32 %v4600_v46, %v4596_v32  ;;  %4351 = vmatprep.subr.mxu0 %v4631_v36 }
0x170c   :  { %4339 = vmatmul.mubr.msk.f32.vlgmr.msra.gmra.mrb[32].mxu1 %vm238_vm2, %v2582_v48  ;;  %4344 = vmatmul.mubr.msk.f32.vlgmr.msra.gmra.mrb[24].mxu0 %vm238_vm2, %v2736_v49 }
0x170d   :  { %4347 = vmatpush3.xpose.msk.msra.mxu1 %vm238_vm2, %v2816_v47  ;;  %4348 = vmatprep.mubr.msk.f32.mxu1 %vm4632_vm1, %v4631_v36 }
0x170e   :  { %4356 = vmatprep.subr.mxu1 %v4631_v36  ;;  %4353 = vmatprep.mubr.msk.f32.mxu0 %vm4632_vm1, %v4631_v36 }
0x1710   :  { %4349 = vmatmul.mubr.msk.f32.vlgmr.msra.gmra.mrb[34].mxu1 %vm238_vm2, %v2814_v50 }
0x1711   :  { %4358 = vmatprep.mubr.msk.f32.mxu1 %vm4632_vm1, %v4631_v36 }
0x17db   :  { %v5186_v51 = vpop.f32.mrb[22].mxu0 }
0x17dc   :  { %v4335_v52 = vpop.f32.mrb[23].mxu0 }
0x17df   :  { %v5188_v53 = vpop.f32.mrb[32].mxu1  ;;  %v2809_v54 = vpop.f32.mrb[24].mxu0 }
0x17e0   :  { %v2810_v55 = vadd.f32 %v2809_v54, %v4818_v56  ;;  %v4340_v35 = vpop.f32.mrb[33].mxu1  ;;  %v4345_v33 = vpop.f32.mrb[25].mxu0 }
0x17e1   :  { %v3996_v33 = vld [vmem:[%s5366_s6 + $0x28] sm:$0xff] }
0x17e2   :  { %v2891_v57 = vsel %vm238_vm2, %v2810_v55, -inf }
0x17e3   :  { %2892 = vmax.xlane.f32.xlu0 %v2891_v57  ;;  %v2887_v58 = vpop.f32.mrb[34].mxu1 }
0x17e4   :  { %v2888_v59 = vadd.f32 %v2887_v58, %v4821_v61  ;;  %v4350_v60 = vpop.f32.mrb[35].mxu1  ;;  %v3997_v58 = vld [vmem:[%s5366_s6 + $0x30] sm:$0xff] }
0x17e6   :  { %v2894_v62 = vsel %vm238_vm2, %v2888_v59, -inf }
0x17e7   :  { %2895 = vmax.xlane.f32.xlu1 %v2894_v62 }
0x17f8   :  { %2989 = vrot.lane.b32.xlu1 %v5084_v30, %s4641_s26 }
0x17f9   :  { %2913 = vrot.lane.b32.xlu0 %v5086_v34, %s4641_s26 }
0x17fc   :  { %3067 = vrot.lane.b32.xlu1 %v5086_v34, %s5399_s5 }
0x1800   :  { %3145 = vrot.lane.b32.xlu1 %v5084_v30, %s5399_s5 }
0x1804   :  { %3143 = vrot.lane.b32.xlu1 %v5103_v38, %s5400_s19 }
0x1870   :  { %v2893_v63 = vpop.xlane.xlu0 %2892 }
0x1871   :  { %v2897_v0 = vsub.f32 %v2810_v55, %v2893_v63 }
0x1873   :  { %v2899_v1 = vmul.f32 1.442695, %v2897_v0 }
0x1874   :  { %v2914_v39 = vpop.permute.xlu0 %2913  ;;  %v2896_v2 = vpop.xlane.xlu1 %2895 }
0x1875   :  { %4601 = vpow2.f32 %v2899_v1  ;;  %v2898_v3 = vsub.f32 %v2888_v59, %v2896_v2  ;;  %4352 = vmatpush3.msra.mxu0 %v2914_v39  ;;  %v3998_v59 = vld [vmem:[%s5366_s6 + $0x38] sm:$0xff] }
0x1876   :  { %4361 = vmatprep.subr.mxu0 %v4631_v36  ;;  %v4485_v60 = vpack.c.bf16 %v3998_v59, %v3997_v58  ;;  %v4017_v58 = vld [vmem:[%s5371_s12 + $0x50] sm:$0xff]  ;;  %v4018_v59 = vld [vmem:[%s5371_s12 + $0x58] sm:$0xff] }
0x1877   :  { %v2901_v4 = vmul.f32 1.442695, %v2898_v3 }
0x1878   :  { %v2990_v5 = vpop.permute.xlu1 %2989 }
0x1879   :  { %4603 = vpow2.f32 %v2901_v4  ;;  %4357 = vmatpush3.msra.mxu1 %v2990_v5 }
0x187a   :  { %4366 = vmatprep.subr.mxu1 %v4631_v36 }
0x187c   :  { %v3068_v12 = vpop.permute.xlu1 %3067 }
0x187f   :  { %v4602_v6 = vpop.eup %4601 }
0x1880   :  { %v2903_v8 = vsel %vm238_vm2, %v4602_v6, 0.0  ;;  %v3146_v16 = vpop.permute.xlu1 %3145 }
0x1881   :  { %2904 = vadd.xlane.f32.xlu0 %v2903_v8 }
0x1883   :  { %v4604_v38 = vpop.eup %4603 }
0x1884   :  { %v2906_v10 = vsel %vm238_vm2, %v4604_v38, 0.0  ;;  %v3144_v18 = vpop.permute.xlu1 %3143 }
0x1885   :  { %2907 = vadd.xlane.f32.xlu0 %v2906_v10 }
0x189b   :  { %3065 = vrot.lane.b32.xlu0 %v5094_v43, %s5400_s19 }
0x190e   :  { %v2905_v11 = vpop.xlane.xlu0 %2904 }
0x190f   :  { %4605 = vrcp.f32 %v2905_v11 }
0x1912   :  { %v2908_v41 = vpop.xlane.xlu0 %2907 }
0x1913   :  { %4607 = vrcp.f32 %v2908_v41 }
0x1916   :  { %v3066_v43 = vpop.permute.xlu0 %3065 }
0x1919   :  { %v4606_v13 = vpop.eup %4605 }
0x191a   :  { %v2911_v14 = vmul.f32 %v4606_v13, %v4602_v6 }
0x191c   :  { %4354 = vmatmul.mubr.msk.f32.vlgmr.msra.gmra.mrb[26].mxu0 %vm238_vm2, %v2911_v14 }
0x191d   :  { %v4608_v15 = vpop.eup %4607  ;;  %4362 = vmatpush3.xpose.msk.msra.mxu0 %vm238_vm2, %v3068_v12  ;;  %4363 = vmatprep.mubr.msk.f32.mxu0 %vm4632_vm1, %v4631_v36 }
0x191e   :  { %v2912_v17 = vmul.f32 %v4608_v15, %v4604_v38  ;;  %4371 = vmatprep.subr.mxu0 %v4631_v36 }
0x1920   :  { %4359 = vmatmul.mubr.msk.f32.vlgmr.msra.gmra.mrb[36].mxu1 %vm238_vm2, %v2912_v17  ;;  %4364 = vmatmul.mubr.msk.f32.vlgmr.msra.gmra.mrb[28].mxu0 %vm238_vm2, %v3066_v43 }
0x1921   :  { %4367 = vmatpush3.xpose.msk.msra.mxu1 %vm238_vm2, %v3146_v16  ;;  %4368 = vmatprep.mubr.msk.f32.mxu1 %vm4632_vm1, %v4631_v36 }
0x1922   :  { %4376 = vmatprep.subr.mxu1 %v4631_v36  ;;  %4373 = vmatprep.mubr.msk.f32.mxu0 %vm4632_vm1, %v4631_v36 }
0x1924   :  { %4369 = vmatmul.mubr.msk.f32.vlgmr.msra.gmra.mrb[38].mxu1 %vm238_vm2, %v3144_v18 }
0x1925   :  { %4378 = vmatprep.mubr.msk.f32.mxu1 %vm4632_vm1, %v4631_v36 }
0x19ef   :  { %v2985_v19 = vpop.f32.mrb[26].mxu0 }
0x19f0   :  { %v4355_v20 = vpop.f32.mrb[27].mxu0 }
0x19f3   :  { %v3061_v21 = vpop.f32.mrb[36].mxu1  ;;  %v3139_v22 = vpop.f32.mrb[28].mxu0 }
0x19f4   :  { %v3140_v23 = vadd.f32 %v3139_v22, %v4818_v56  ;;  %v4360_v24 = vpop.f32.mrb[37].mxu1  ;;  %v4365_v45 = vpop.f32.mrb[29].mxu0 }
0x19f6   :  { %v3221_v27 = vsel %vm238_vm2, %v3140_v23, -inf }
0x19f7   :  { %3222 = vmax.xlane.f32.xlu0 %v3221_v27  ;;  %v3217_v28 = vpop.f32.mrb[38].mxu1 }
0x19f8   :  { %v3218_v32 = vadd.f32 %v3217_v28, %v4821_v61  ;;  %v4370_v29 = vpop.f32.mrb[39].mxu1 }
0x19fa   :  { %v3224_v37 = vsel %vm238_vm2, %v3218_v32, -inf }
0x19fb   :  { %3225 = vmax.xlane.f32.xlu1 %v3224_v37  ;;  %v4009_v37 = vld [vmem:[%s5368_s10 + $0x30] sm:$0xff] }
0x1a0c   :  { %3319 = vrot.lane.b32.xlu1 %v5084_v30, %s5401_s1 }
0x1a10   :  { %3397 = vrot.lane.b32.xlu1 %v5186_v51, %s5402_s22 }
0x1a14   :  { %3399 = vrot.lane.b32.xlu1 %v5188_v53, %s5402_s22 }
0x1a18   :  { %3407 = vrot.lane.b32.xlu1 %v3061_v21, %s5403_s2 }
0x1a84   :  { %v3223_v56 = vpop.xlane.xlu0 %3222 }
0x1a85   :  { %v3227_v40 = vsub.f32 %v3140_v23, %v3223_v56  ;;  %v4010_v56 = vld [vmem:[%s5368_s10 + $0x38] sm:$0xff] }
0x1a87   :  { %v3229_v42 = vmul.f32 1.442695, %v3227_v40  ;;  %v4493_v40 = vpack.c.bf16 %v4010_v56, %v4009_v37 }
0x1a88   :  { %v3226_v44 = vpop.xlane.xlu1 %3225 }
0x1a89   :  { %4609 = vpow2.f32 %v3229_v42  ;;  %v3228_v61 = vsub.f32 %v3218_v32, %v3226_v44  ;;  %v4008_v32 = vld [vmem:[%s5368_s10 + $0x28] sm:$0xff] }
0x1a8b   :  { %v3231_v31 = vmul.f32 1.442695, %v3228_v61 }
0x1a8c   :  { %v3320_v46 = vpop.permute.xlu1 %3319 }
0x1a8d   :  { %4611 = vpow2.f32 %v3231_v31  ;;  %4377 = vmatpush3.msra.mxu1 %v3320_v46 }
0x1a90   :  { %v3398_v39 = vpop.permute.xlu1 %3397 }
0x1a91   :  { %v3419_v4 = vsel %vm238_vm2, %v5146_v7, %v3398_v39  ;;  %v4000_v7 = vld [vmem:[%s5367_s7 + $0x1] ss:$0 sm:$0xff] }
0x1a93   :  { %v4610_v47 = vpop.eup %4609 }
0x1a94   :  { %v3233_v30 = vsel %vm238_vm2, %v4610_v47, 0.0  ;;  %v3400_v2 = vpop.permute.xlu1 %3399 }
0x1a95   :  { %3234 = vadd.xlane.f32.xlu0 %v3233_v30  ;;  %v3420_v10 = vsel %vm238_vm2, %v5148_v9, %v3400_v2  ;;  %v4012_v2 = vld [vmem:[%s5372_s11 + $0x1] ss:$0 sm:$0xff] }
0x1a97   :  { %v4612_v48 = vpop.eup %4611 }
0x1a98   :  { %v3236_v49 = vsel %vm238_vm2, %v4612_v48, 0.0  ;;  %v3408_v5 = vpop.permute.xlu1 %3407 }
0x1a99   :  { %3237 = vadd.xlane.f32.xlu0 %v3236_v49  ;;  %v3422_v11 = vsel %vm1582_vm4, %v3420_v10, %v3408_v5 }
0x1aaf   :  { %3243 = vrot.lane.b32.xlu0 %v5086_v34, %s5401_s1  ;;  %v3995_v34 = vld [vmem:[%s5366_s6 + $0x20] sm:$0xff] }
0x1ab0   :  { %v4481_v57 = vpack.c.bf16 %v3996_v33, %v3995_v34  ;;  %v4015_v34 = vld [vmem:[%s5371_s12 + $0x40] sm:$0xff]  ;;  %v4016_v33 = vld [vmem:[%s5371_s12 + $0x48] sm:$0xff] }
0x1ab3   :  { %3405 = vrot.lane.b32.xlu0 %v2985_v19, %s5403_s2 }
0x1b22   :  { %v3235_v50 = vpop.xlane.xlu0 %3234 }
0x1b23   :  { %4613 = vrcp.f32 %v3235_v50  ;;  %v4006_v50 = vld [vmem:[%s5370_s9 + $0x1] ss:$0 sm:$0xff] }
0x1b26   :  { %v3238_v51 = vpop.xlane.xlu0 %3237 }
0x1b27   :  { %4615 = vrcp.f32 %v3238_v51 }
0x1b2a   :  { %v3244_v52 = vpop.permute.xlu0 %3243 }
0x1b2b   :  { %4372 = vmatpush3.msra.mxu0 %v3244_v52 }
0x1b2c   :  { %4482 = vmatprep.subr.bf16.mxu0 %v4481_v57 }
0x1b2d   :  { %v4614_v53 = vpop.eup %4613 }
0x1b2e   :  { %v3241_v54 = vmul.f32 %v4614_v53, %v4610_v47  ;;  %v3406_v3 = vpop.permute.xlu0 %3405 }
0x1b2f   :  { %v3421_v6 = vsel %vm1582_vm4, %v3419_v4, %v3406_v3 }
0x1b30   :  { %4374 = vmatmul.mubr.msk.f32.vlgmr.msra.gmra.mrb[30].mxu0 %vm238_vm2, %v3241_v54 }
0x1b31   :  { %v4616_v55 = vpop.eup %4615  ;;  %4484 = vmatpush3.bf16.msra.mxu0 %v4481_v57  ;;  %v4497_v57 = vpack.c.bf16 %v4016_v33, %v4015_v34 }
0x1b32   :  { %v3242_v35 = vmul.f32 %v4616_v55, %v4612_v48  ;;  %4486 = vmatprep.subr.bf16.mxu0 %v4485_v60  ;;  %v4005_v48 = vld [vmem:[%s5369_s8 + $0x1] ss:$0 sm:$0xff] }
0x1b34   :  { %4379 = vmatmul.mubr.msk.f32.vlgmr.msra.gmra.mrb[40].mxu1 %vm238_vm2, %v3242_v35 }
0x1b35   :  { %4488 = vmatpush3.bf16.msra.mxu0 %v4485_v60  ;;  %v4019_v60 = vld [vmem:[%s5371_s12 + $0x60] sm:$0xff] }
0x1b36   :  { %4498 = vmatprep.subr.bf16.mxu0 %v4497_v57 }
0x1c03   :  { %v3315_v62 = vpop.f32.mrb[30].mxu0 }
0x1c04   :  { %3413 = vrot.lane.b32.xlu0 %v3315_v62, %s5404_s30  ;;  %v4375_v63 = vpop.f32.mrb[31].mxu0  ;;  %v4020_v62 = vld [vmem:[%s5371_s12 + $0x68] sm:$0xff] }
0x1c05   :  { %v4505_v63 = vpack.c.bf16 %v4020_v62, %v4019_v60  ;;  %v4030_v62 = vld [vmem:[%s5375_s15 + $0x1] ss:$0 sm:$0xff] }
0x1c07   :  { %v3391_v0 = vpop.f32.mrb[40].mxu1 }
0x1c08   :  { %3415 = vrot.lane.b32.xlu1 %v3391_v0, %s5404_s30  ;;  %v4380_v1 = vpop.f32.mrb[41].mxu1  ;;  %v4021_v0 = vld [vmem:[%s5371_s12 + $0x70] sm:$0xff] }
0x1c09   :  { %v4022_v1 = vld [vmem:[%s5371_s12 + $0x78] sm:$0xff] }
0x1c0a   :  { %v4509_v39 = vpack.c.bf16 %v4022_v1, %v4021_v0 }
0x1c76   :  { %v3414_v8 = vpop.permute.xlu0 %3413 }
0x1c77   :  { %v3423_v38 = vsel %vm1585_vm3, %v3421_v6, %v3414_v8 }
0x1c78   :  { %4389 = vmatprep.mubr.msk.f32.mxu0 %vm63_vm0, %v3423_v38 }
0x1c7a   :  { %v3416_v41 = vpop.permute.xlu1 %3415 }
0x1c7b   :  { %v3424_v12 = vsel %vm1585_vm3, %v3422_v11, %v3416_v41 }
0x1c7c   :  { %4390 = vmatmul.mubr.msk.f32.vlgmr.msra.gmra.mrb[32].mxu0 %vm63_vm0, %v3424_v12 }
0x1c7d   :  { %4500 = vmatpush3.bf16.msra.mxu0 %v4497_v57 }
0x1d4f   :  { %v4391_v13 = vpop.f32.mrb[32].mxu0 }
0x1d50   :  { %v3516_v14 = vadd.f32 %v4391_v13, %v4000_v7  ;;  %v3510_v15 = vpop.f32.mrb[33].mxu0 }
0x1d51   :  { %v3511_v16 = vadd.f32 %v4000_v7, %v3510_v15 }
0x1d52   :  { %v3520_v17 = vadd.f32 %v3516_v14, %v5073_v26 }
0x1d53   :  { %v3519_v43 = vadd.f32 %v3511_v16, %v5071_v25  ;;  %v4007_v25 = vld [vmem:[%s5368_s10 + $0x20] sm:$0xff] }
0x1d54   :  { %v3528_v9 = vsel %vm63_vm0, %v3520_v17, 0.0  ;;  %v4489_v29 = vpack.c.bf16 %v4008_v32, %v4007_v25 }
0x1d55   :  { %3529 = vadd.xlane.f32.xlu1 %v3528_v9  ;;  %v3525_v18 = vsel %vm63_vm0, %v3519_v43, 0.0 }
0x1d56   :  { %3526 = vadd.xlane.f32.xlu0 %v3525_v18  ;;  %4490 = vmatprep.subr.bf16.mxu1 %v4489_v29 }
0x1d57   :  { %4492 = vmatpush3.bf16.msra.mxu1 %v4489_v29 }
0x1d58   :  { %4494 = vmatprep.subr.bf16.mxu1 %v4493_v40 }
0x1d5b   :  { %4496 = vmatpush3.bf16.msra.mxu1 %v4493_v40 }
0x1de2   :  { %v3530_v19 = vpop.xlane.xlu1 %3529 }
0x1de3   :  { %v3532_v20 = vmul.f32 0.03125, %v3530_v19  ;;  %v3527_v21 = vpop.xlane.xlu0 %3526 }
0x1de4   :  { %v3531_v22 = vmul.f32 0.03125, %v3527_v21 }
0x1de5   :  { %v3534_v23 = vsub.f32 %v3520_v17, %v3532_v20 }
0x1de6   :  { %v3533_v24 = vsub.f32 %v3519_v43, %v3531_v22  ;;  %v4024_v22 = vld [vmem:[%s5373_s13 + $0x1] ss:$0 sm:$0xff] }
0x1de7   :  { %v3536_v28 = vmul.f32 %v3534_v23, %v3534_v23 }
0x1de8   :  { %v3535_v45 = vmul.f32 %v3533_v24, %v3533_v24 }
0x1de9   :  { %v3540_v26 = vsel %vm63_vm0, %v3536_v28, 0.0 }
0x1dea   :  { %v3537_v27 = vsel %vm63_vm0, %v3535_v45, 0.0 }
0x1deb   :  { %3538 = vadd.xlane.f32.xlu0 %v3537_v27 }
0x1def   :  { %3541 = vadd.xlane.f32.xlu0 %v3540_v26 }
0x1e78   :  { %v3539_v42 = vpop.xlane.xlu0 %3538 }
0x1e79   :  { %v3543_v44 = vmul.f32 0.03125, %v3539_v42 }
0x1e7b   :  { %v3545_v61 = vadd.f32 1e-12, %v3543_v44 }
0x1e7c   :  { %v3542_v31 = vpop.xlane.xlu0 %3541 }
0x1e7d   :  { %4617 = vrsqrt.f32 %v3545_v61  ;;  %v3544_v46 = vmul.f32 0.03125, %v3542_v31 }
0x1e7f   :  { %v3546_v47 = vadd.f32 1e-12, %v3544_v46 }
0x1e81   :  { %4619 = vrsqrt.f32 %v3546_v47 }
0x1e87   :  { %v4618_v30 = vpop.eup %4617 }
0x1e88   :  { %v3549_v49 = vmul.f32 %v4618_v30, %v3533_v24  ;;  %v3825_v30 = vld [vmem:[%s5376_s16] sm:$0xff] }
0x1e8a   :  { %v3557_v51 = vmul.f32 %v4005_v48, %v3549_v49 }
0x1e8b   :  { %v4620_v52 = vpop.eup %4619 }
0x1e8c   :  { %v3550_v53 = vmul.f32 %v4620_v52, %v3534_v23  ;;  %v3565_v54 = vadd.f32 %v4006_v50, %v3557_v51  ;;  %v3828_v51 = vld [vmem:[%s5376_s16 + $0x18] sm:$0xff]  ;;  %v4648_v52 = vmov 0.0|0.0  }
0x1e8d   :  { %4513 = vmatprep.subr.bf16.mxu1 %v4648_v52 }
0x1e8e   :  { %v3558_v55 = vmul.f32 %v4005_v48, %v3550_v53  ;;  %4400 = vmatprep.mubr.msk.f32.mxu1 %vm63_vm0, %v3565_v54  ;;  %v3826_v48 = vld [vmem:[%s5376_s16 + $0x8] sm:$0xff] }
0x1e8f   :  { %v4514_v49 = vpack.c.bf16 %v3826_v48, %v3825_v30 }
0x1e90   :  { %v3566_v35 = vadd.f32 %v4006_v50, %v3558_v55  ;;  %v3827_v50 = vld [vmem:[%s5376_s16 + $0x10] sm:$0xff] }
0x1e91   :  { %v4517_v53 = vpack.c.bf16 %v3828_v51, %v3827_v50 }
0x1e92   :  { %4401 = vmatmul.mubr.msk.f32.vlgmr.msra.gmra.mrb[42].mxu1 %vm63_vm0, %v3566_v35 }
0x1e93   :  { %4430 = vmatprep.mubr.msk.f32.mxu1 %vm4632_vm1, %v4631_v36  ;;  %v4501_v36 = vpack.c.bf16 %v4018_v59, %v4017_v58  ;;  %4515 = vmatpush3.bf16.msra.mxu1 %v4514_v49  ;;  %v4029_v59 = vld [vmem:[%s5374_s14 + $0x1] ss:$0 sm:$0xff] }
0x1e94   :  { %4516 = vmatprep.subr.bf16.mxu1 %v4648_v52 }
0x1e95   :  { %4502 = vmatprep.subr.bf16.mxu0 %v4501_v36 }
0x1e96   :  { %4504 = vmatpush3.bf16.msra.mxu0 %v4501_v36 }
0x1e97   :  { %4506 = vmatprep.subr.bf16.mxu0 %v4505_v63  ;;  %4518 = vmatpush3.bf16.msra.mxu1 %v4517_v53 }
0x1e9a   :  { %4508 = vmatpush3.bf16.msra.mxu0 %v4505_v63 }
0x1e9b   :  { %4510 = vmatprep.subr.bf16.mxu0 %v4509_v39 }
0x1e9e   :  { %4512 = vmatpush3.bf16.msra.mxu0 %v4509_v39 }
0x1f65   :  { %v4402_v3 = vpop.f32.mrb[42].mxu1 }
0x1f66   :  { %v3658_v4 = vadd.f32 %v4402_v3, %v4012_v2  ;;  %v3652_v5 = vpop.f32.mrb[43].mxu1 }
0x1f67   :  { %v3653_v6 = vadd.f32 %v4012_v2, %v3652_v5  ;;  %v4031_v5 = vld [vmem:[%s5377_s17] ss:$0 sm:$0xff] }
0x1f68   :  { %v3662_v8 = vmul.f32 %v3658_v4, %v3658_v4 }
0x1f69   :  { %v3661_v38 = vmul.f32 %v3653_v6, %v3653_v6 }
0x1f6a   :  { %v3664_v10 = vmul.f32 %v3662_v8, %v3658_v4 }
0x1f6b   :  { %v3663_v11 = vmul.f32 %v3661_v38, %v3653_v6 }
0x1f6c   :  { %v3666_v41 = vmul.f32 0.044715, %v3664_v10 }
0x1f6d   :  { %v3665_v12 = vmul.f32 0.044715, %v3663_v11 }
0x1f6e   :  { %v3668_v7 = vadd.f32 %v3666_v41, %v3658_v4 }
0x1f6f   :  { %v3667_v13 = vadd.f32 %v3665_v12, %v3653_v6 }
0x1f70   :  { %v3670_v14 = vmul.f32 0.7978846, %v3668_v7 }
0x1f71   :  { %v3669_v15 = vmul.f32 0.7978846, %v3667_v13 }
0x1f72   :  { %4621 = vtanh.f32 %v3670_v14 }
0x1f73   :  { %4623 = vtanh.f32 %v3669_v15 }
0x1f7c   :  { %v4622_v16 = vpop.eup %4621 }
0x1f7d   :  { %v4624_v17 = vpop.eup %4623  ;;  %v3674_v43 = vadd.f32 1.0, %v4622_v16 }
0x1f7e   :  { %v3673_v9 = vadd.f32 1.0, %v4624_v17 }
0x1f7f   :  { %v3676_v18 = vmul.f32 0.5, %v3674_v43 }
0x1f80   :  { %v3675_v19 = vmul.f32 0.5, %v3673_v9 }
0x1f81   :  { %v3678_v21 = vmul.f32 %v3676_v18, %v3658_v4 }
0x1f82   :  { %v3677_v20 = vmul.f32 %v3675_v19, %v3653_v6 }
0x1f84   :  { %4419 = vmatprep.mubr.msk.f32.mxu0 %vm1851_vm5, %v3677_v20 }
0x1f85   :  { %4420 = vmatmul.mubr.msk.f32.vlgmr.msra.gmra.mrb[34].mxu0 %vm1851_vm5, %v3678_v21 }
0x2058   :  { %v4421_v23 = vpop.f32.mrb[34].mxu0 }
0x2059   :  { %v3774_v24 = vadd.f32 %v4421_v23, %v4024_v22  ;;  %v3768_v45 = vpop.f32.mrb[35].mxu0 }
0x205a   :  { %v3769_v27 = vadd.f32 %v4024_v22, %v3768_v45 }
0x205b   :  { %v3778_v28 = vadd.f32 %v3774_v24, %v3566_v35 }
0x205c   :  { %v3777_v26 = vadd.f32 %v3769_v27, %v3565_v54 }
0x205d   :  { %v3786_v25 = vsel %vm63_vm0, %v3778_v28, 0.0 }
0x205e   :  { %3787 = vadd.xlane.f32.xlu0 %v3786_v25  ;;  %v3783_v32 = vsel %vm63_vm0, %v3777_v26, 0.0 }
0x205f   :  { %3784 = vadd.xlane.f32.xlu1 %v3783_v32 }
0x20eb   :  { %v3788_v29 = vpop.xlane.xlu0 %3787 }
0x20ec   :  { %v3790_v37 = vmul.f32 0.03125, %v3788_v29  ;;  %v3785_v56 = vpop.xlane.xlu1 %3784 }
0x20ed   :  { %v3789_v40 = vmul.f32 0.03125, %v3785_v56 }
0x20ee   :  { %v3792_v42 = vsub.f32 %v3778_v28, %v3790_v37 }
0x20ef   :  { %v3791_v44 = vsub.f32 %v3777_v26, %v3789_v40 }
0x20f0   :  { %v3794_v61 = vmul.f32 %v3792_v42, %v3792_v42 }
0x20f1   :  { %v3793_v31 = vmul.f32 %v3791_v44, %v3791_v44 }
0x20f2   :  { %v3798_v46 = vsel %vm63_vm0, %v3794_v61, 0.0 }
0x20f3   :  { %3799 = vadd.xlane.f32.xlu0 %v3798_v46  ;;  %v3795_v47 = vsel %vm63_vm0, %v3793_v31, 0.0 }
0x20f4   :  { %3796 = vadd.xlane.f32.xlu1 %v3795_v47 }
0x2180   :  { %v3800_v54 = vpop.xlane.xlu0 %3799 }
0x2181   :  { %v3802_v55 = vmul.f32 0.03125, %v3800_v54  ;;  %v3797_v35 = vpop.xlane.xlu1 %3796 }
0x2182   :  { %v3801_v34 = vmul.f32 0.03125, %v3797_v35 }
0x2183   :  { %v3804_v33 = vadd.f32 1e-12, %v3802_v55 }
0x2184   :  { %v3803_v57 = vadd.f32 1e-12, %v3801_v34 }
0x2185   :  { %4625 = vrsqrt.f32 %v3804_v33 }
0x2186   :  { %4627 = vrsqrt.f32 %v3803_v57 }
0x218f   :  { %v4626_v58 = vpop.eup %4625 }
0x2190   :  { %v4628_v36 = vpop.eup %4627  ;;  %v3808_v60 = vmul.f32 %v4626_v58, %v3792_v42 }
0x2191   :  { %v3807_v63 = vmul.f32 %v4628_v36, %v3791_v44 }
0x2192   :  { %v3816_v0 = vmul.f32 %v4029_v59, %v3808_v60 }
0x2193   :  { %v3815_v1 = vmul.f32 %v4029_v59, %v3807_v63 }
0x2194   :  { %v3824_v39 = vadd.f32 %v4030_v62, %v3816_v0 }
0x2195   :  { %v3823_v2 = vadd.f32 %v4030_v62, %v3815_v1 }
0x2196   :  { %v3838_v3 = vrot.slane %v3824_v39, 7 }
0x2198   :  { %v3840_v4 = vsel %vm3839_vm6, %v3838_v3, %v3823_v2 }
0x2199   :  { %4431 = vmatmul.mubr.msk.f32.vlgmr.msra.gmra.mrb[44].mxu1 %vm63_vm0, %v3840_v4 }
0x226c   :  { %v3909_v6 = vpop.f32.mrb[44].mxu1 }
0x226d   :  { %v3910_v8 = vadd.f32 %v4031_v5, %v3909_v6  ;;  %v4432_v38 = vpop.f32.mrb[45].mxu1 }
0x226f   :  { %4629 = vtanh.f32 %v3910_v8 }
0x2279   :  { %v4630_v10 = vpop.eup %4629 }
0x227a   :  { %3915 = vst.msk [vmem:[%s5378_s18] sm:$0x3] %vm3914_vm7, %v4630_v10 }

</bundles_post_ra>
